<compile_context>
chip_gen: v6e
topology: v6e:2x2x1
jax: 0.10.0
libtpu: 0.0.40
codegen_flags: <defaults>
</compile_context>

<pallas_src>
import functools
import math

import numpy as np

import jax
import jax.numpy as jnp
from jax.experimental import pallas as pl

HIDDEN = 32
NUM_HEADS = 4
HEAD_DIM = HIDDEN // NUM_HEADS
LN_EPS = 1e-12          # BERT layer_norm_eps
MAX_REL_POS = 64        # NeZha default when config has no max_relative_position


# ----------------------------------------------------------------------------
# Fused Pallas kernel: whole batch / both attention directions in one invocation.
# ----------------------------------------------------------------------------
def _duma_kernel(xq_ref, xkv_ref, w_ref, b_ref, relf_ref, hmask_ref,
                 repq_ref, sumd_ref, repp_ref, sumt_ref, bsum_ref, out_ref):
    f32 = jnp.float32
    S = relf_ref.shape[0]                # sequence length
    RS, H = xq_ref.shape                 # RS = 2 * B * S
    R = RS // S                          # (batch, direction) groups
    B = R // 2
    NH = NUM_HEADS
    V = NH * S                           # score lanes per row (heads in lanes)
    scale = 1.0 / math.sqrt(HEAD_DIM)

    xq = xq_ref[...]                     # [RS, H] query-side rows
    xkv = xkv_ref[...]                   # [RS, H] key/value-side rows (pair-swapped)

    # ---- Q / K / V projections (weights pre-transposed; three small MXU matmuls).
    q = jnp.dot(xq, w_ref[0:H, :], preferred_element_type=f32) + b_ref[0:1, :]
    k = jnp.dot(xkv, w_ref[H:2 * H, :], preferred_element_type=f32) + b_ref[1:2, :]
    v = jnp.dot(xkv, w_ref[2 * H:3 * H, :], preferred_element_type=f32) + b_ref[2:3, :]

    # ---- Head-masked "block diagonal" K / V expansions: [R, NH*S, H] with
    #      k_exp[r, h*S+t, c] = k[r, t, c] if channel c belongs to head h, else 0.
    #      Built with aligned 16-row sublane concats + one VPU multiply (no relayouts).
    hmask = hmask_ref[...][None]                               # [1, NH*S, H]
    k3 = k.reshape(R, S, H)
    v3 = v.reshape(R, S, H)
    k_exp = jnp.concatenate([k3] * NH, axis=1) * hmask         # [R, NH*S, H]
    v_exp = jnp.concatenate([v3] * NH, axis=1) * hmask         # [R, NH*S, H]

    # ---- Content scores for all (batch, direction, head) at once; heads in lanes.
    q3 = q.reshape(R, S, H)
    content = jnp.einsum('rfh,rnh->rfn', q3, k_exp,
                         preferred_element_type=f32)           # [R, S, NH*S]

    # ---- Relative-position table replicated with aligned vreg copies (no HBM tiling).
    relf = relf_ref[...]                                       # [S, S*Dh]
    relb = jnp.concatenate([relf] * NH, axis=1)                # [S, NH*S*Dh]
    relb = jnp.concatenate([relb] * R, axis=0)                 # [RS, NH*S*Dh]

    # ---- Key position scores on the MXU:
    #      rel_k[(r,f), h*S+t] = sum_d q[(r,f), h*Dh+d] * rel[f, t, d]
    b1 = jnp.dot(q, repq_ref[...], preferred_element_type=f32)            # [RS, NH*S*Dh]
    relk = jnp.dot(b1 * relb, sumd_ref[...], preferred_element_type=f32)  # [RS, NH*S]

    scores = (content + relk.reshape(R, S, V)) * scale                    # [R, S, NH*S]

    # ---- Softmax over the S keys of each head block. Subtracting the per-row max
    #      (constant across keys) leaves the softmax unchanged; per-head denominators
    #      come from a 0/1 block-sum matmul so no strided lane reductions are needed.
    m = jnp.max(scores, axis=-1, keepdims=True)
    e = jnp.exp(scores - m)
    e2 = e.reshape(RS, V)
    denom = jnp.dot(e2, bsum_ref[...], preferred_element_type=f32)        # [RS, NH*S]
    probs = e2 * pl.reciprocal(denom, approx=True)                        # [RS, NH*S]

    # ---- Context (all heads at once) + value position scores.
    ctx = jnp.einsum('rfn,rnh->rfh', probs.reshape(R, S, V), v_exp,
                     preferred_element_type=f32)                          # [R, S, H]
    p1 = jnp.dot(probs, repp_ref[...], preferred_element_type=f32)        # [RS, NH*S*Dh]
    relv = jnp.dot(p1 * relb, sumt_ref[...], preferred_element_type=f32)  # [RS, H]
    enc = ctx.reshape(RS, H) + relv                                       # [RS, H]

    # ---- MeanPooler (shared dense) on both encoder outputs at once.
    pooled = jnp.tanh(jnp.dot(enc, w_ref[3 * H:4 * H, :],
                              preferred_element_type=f32) + b_ref[3:4, :])  # [RS, H]

    # ---- Split doc / ques_option rows (static, 16-row-aligned slices).
    doc_pool = jnp.concatenate(
        [pooled[(2 * b) * S:(2 * b + 1) * S, :] for b in range(B)], axis=0)   # [B*S, H]
    qo_pool = jnp.concatenate(
        [pooled[(2 * b + 1) * S:(2 * b + 2) * S, :] for b in range(B)], axis=0)

    # ---- BertSelfOutput: dense(doc_pool) + residual(qo_pool) + LayerNorm
    #      (dropout = identity / eval mode).
    h = jnp.dot(doc_pool, w_ref[4 * H:5 * H, :], preferred_element_type=f32)
    h = h + b_ref[4:5, :] + qo_pool
    mean = jnp.mean(h, axis=-1, keepdims=True)
    var = jnp.mean(jnp.square(h - mean), axis=-1, keepdims=True)
    h = (h - mean) * jax.lax.rsqrt(var + LN_EPS) * b_ref[5:6, :] + b_ref[6:7, :]

    # ---- Final MeanPooler.
    out = jnp.tanh(jnp.dot(h, w_ref[3 * H:4 * H, :],
                           preferred_element_type=f32) + b_ref[3:4, :])   # [B*S, H]
    out_ref[...] = out.astype(out_ref.dtype)


# ----------------------------------------------------------------------------
# Wrapper around pallas_call (no grid: everything fits VMEM many times over).
# ----------------------------------------------------------------------------
def duma_fused_call(xq, xkv, wslab, bslab, consts):
    RS, H = xq.shape
    S = consts[0].shape[0]
    B = RS // (2 * S)
    out2d = pl.pallas_call(
        _duma_kernel,
        out_shape=jax.ShapeDtypeStruct((B * S, H), xq.dtype),
    )(xq, xkv, wslab, bslab, *consts)
    return out2d.reshape(B, S, H)


# ----------------------------------------------------------------------------
# Constants (numpy, cached per sequence length) and parameter packing.
# ----------------------------------------------------------------------------
def _relative_positions_encoding_np(length, depth, max_relative_position=MAX_REL_POS):
    vocab_size = 2 * max_relative_position + 1
    r = np.arange(length)
    distance = r[None, :] - r[:, None]                     # [i, j] = j - i
    final_mat = np.clip(distance, -max_relative_position, max_relative_position)
    final_mat = final_mat + max_relative_position
    position = np.arange(vocab_size, dtype=np.float32)[:, None]
    div_term = np.exp(np.arange(0, depth, 2, dtype=np.float32)
                      * (-math.log(10000.0) / depth))
    table = np.zeros((vocab_size, depth), dtype=np.float32)
    table[:, 0::2] = np.sin(position * div_term)
    table[:, 1::2] = np.cos(position * div_term)
    return table[final_mat]                                # [length, length, depth]


@functools.lru_cache(maxsize=None)
def _build_constants(S):
    """Rel table (untiled) + 0/1 selector matrices for the MXU formulation."""
    NH, Dh = NUM_HEADS, HEAD_DIM
    f32 = np.float32

    rel = _relative_positions_encoding_np(S, Dh)                       # [S, S, Dh]
    rel_flat = np.ascontiguousarray(rel.reshape(S, S * Dh), dtype=f32)  # [S, S*Dh]

    # head channel mask: [h*S+t, h'*Dh+d] = delta(h, h')
    hmask = np.kron(np.eye(NH, dtype=f32), np.ones((S, Dh), f32))       # [NH*S, H]
    # Rep_q: [h*Dh+d, h*S*Dh + t*Dh + d'] = delta(d, d')
    repq = np.kron(np.eye(NH, dtype=f32), np.tile(np.eye(Dh, dtype=f32), (1, S)))
    # SumD: [h*S*Dh + t*Dh + d, h'*S + t'] = delta(h, h') * delta(t, t')
    sumd = np.kron(np.eye(NH, dtype=f32),
                   np.kron(np.eye(S, dtype=f32), np.ones((Dh, 1), f32)))
    repp = np.ascontiguousarray(sumd.T)                                 # [NH*S, NH*S*Dh]
    sumt = np.ascontiguousarray(repq.T)                                 # [NH*S*Dh, H]
    # per-head block row-sum: [h*S+t, h'*S+t'] = delta(h, h')
    bsum = np.kron(np.eye(NH, dtype=f32), np.ones((S, S), f32))         # [NH*S, NH*S]
    return rel_flat, hmask, repq, sumd, repp, sumt, bsum


def pack_params(p):
    """One [5H, H] weight slab (pre-transposed) + one [8, H] bias/LN slab."""
    wslab = jnp.concatenate(
        [p["wq"].T, p["wk"].T, p["wv"].T, p["wp"].T, p["wo"].T], axis=0)   # [5H, H]
    bslab = jnp.stack(
        [p["bq"], p["bk"], p["bv"], p["bp"], p["bo"],
         p["ln_g"], p["ln_b"], jnp.zeros_like(p["bq"])], axis=0)           # [8, H]
    return wslab, bslab


def separate_seq_jax(seq, doc_len, ques_len, option_len):
    # Only doc_seq_output and ques_option_seq_output are consumed by DUMA.forward.
    # Per-example dynamic-length gather stays in plain JAX outside the kernel.
    B, S, _ = seq.shape
    pos = jnp.arange(S)

    doc_idx = jnp.broadcast_to(jnp.clip(pos[None, :] + 1, 0, S - 1), (B, S))
    doc_gather = jnp.take_along_axis(seq, doc_idx[:, :, None], axis=1)
    doc_mask = (pos[None, :] < doc_len[:, None])[:, :, None]
    doc_seq = jnp.where(doc_mask, doc_gather, 0.0)

    qo_idx = jnp.clip(doc_len[:, None] + 1 + pos[None, :], 0, S - 1)
    qo_gather = jnp.take_along_axis(seq, qo_idx[:, :, None], axis=1)
    qo_mask = (pos[None, :] < (ques_len + option_len)[:, None])[:, :, None]
    qo_seq = jnp.where(qo_mask, qo_gather, 0.0)
    return doc_seq, qo_seq


def init_params(key):
    ks = jax.random.split(key, 5)
    n = lambda k: (0.02 * jax.random.normal(k, (HIDDEN, HIDDEN), jnp.float32))
    return {
        "wq": n(ks[0]), "bq": jnp.zeros((HIDDEN,), jnp.float32),
        "wk": n(ks[1]), "bk": jnp.zeros((HIDDEN,), jnp.float32),
        "wv": n(ks[2]), "bv": jnp.zeros((HIDDEN,), jnp.float32),
        "wp": n(ks[3]), "bp": jnp.zeros((HIDDEN,), jnp.float32),   # MeanPooler.dense
        "wo": n(ks[4]), "bo": jnp.zeros((HIDDEN,), jnp.float32),   # BertSelfOutput.dense
        "ln_g": jnp.ones((HIDDEN,), jnp.float32),
        "ln_b": jnp.zeros((HIDDEN,), jnp.float32),
    }


@jax.jit
def duma_forward(seq, doc_len, ques_len, option_len, params):
    # TODO(synk): dropout layers are identity (eval-mode); attention_mask=None path only.
    B, S, H = seq.shape
    doc_seq, qo_seq = separate_seq_jax(seq, doc_len, ques_len, option_len)
    # Query rows: [doc_0, qo_0, doc_1, qo_1, ...]; key/value rows: pair-swapped, so the
    # kernel never has to relayout between the two attention directions.
    xq = jnp.stack([doc_seq, qo_seq], axis=1).reshape(2 * B * S, H)
    xkv = jnp.stack([qo_seq, doc_seq], axis=1).reshape(2 * B * S, H)
    wslab, bslab = pack_params(params)
    consts = tuple(jnp.asarray(c) for c in _build_constants(S))
    return duma_fused_call(xq, xkv, wslab, bslab, consts)


# ----------------------------------------------------------------------------
# Pure-JAX reference (mirrors the PyTorch forward) for a correctness check.
# ----------------------------------------------------------------------------
def _attention_ref(q_in, kv_in, p, rel):
    B, S, H = q_in.shape
    lin = lambda x, w, b: x @ w.T + b
    sh = lambda x: x.reshape(B, S, NUM_HEADS, HEAD_DIM).transpose(0, 2, 1, 3)
    q = sh(lin(q_in, p["wq"], p["bq"]))
    k = sh(lin(kv_in, p["wk"], p["bk"]))
    v = sh(lin(kv_in, p["wv"], p["bv"]))
    scores = jnp.einsum("bhfd,bhtd->bhft", q, k)
    scores = scores + jnp.einsum("bhfd,ftd->bhft", q, rel)
    scores = scores / math.sqrt(HEAD_DIM)
    probs = jax.nn.softmax(scores, axis=-1)
    ctx = jnp.einsum("bhft,bhtd->bhfd", probs, v)
    ctx = ctx + jnp.einsum("bhft,ftd->bhfd", probs, rel)
    return ctx.transpose(0, 2, 1, 3).reshape(B, S, H)


def duma_ref(seq, doc_len, ques_len, option_len, p):
    S = seq.shape[1]
    rel = jnp.asarray(_relative_positions_encoding_np(S, HEAD_DIM))
    doc_seq, qo_seq = separate_seq_jax(seq, doc_len, ques_len, option_len)
    doc_enc = _attention_ref(doc_seq, qo_seq, p, rel)
    qo_enc = _attention_ref(qo_seq, doc_seq, p, rel)
    pooler = lambda x: jnp.tanh(x @ p["wp"].T + p["bp"])
    doc_pool = pooler(doc_enc)
    qo_pool = pooler(qo_enc)
    h = doc_pool @ p["wo"].T + p["bo"] + qo_pool
    mean = jnp.mean(h, axis=-1, keepdims=True)
    var = jnp.mean((h - mean) ** 2, axis=-1, keepdims=True)
    h = (h - mean) / jnp.sqrt(var + LN_EPS) * p["ln_g"] + p["ln_b"]
    return pooler(h)


# ----------------------------------------------------------------------------
if __name__ == "__main__":
    B, S = 2, 16
    key = jax.random.PRNGKey(0)
    k_seq, k_par = jax.random.split(key)

    sequence_output = jax.random.normal(k_seq, (B, S, HIDDEN), dtype=jnp.float32)
    doc_len = jnp.array([5, 6], dtype=jnp.int32)
    ques_len = jnp.array([3, 4], dtype=jnp.int32)
    option_len = jnp.array([2, 3], dtype=jnp.int32)

    params = init_params(k_par)

    out = duma_forward(sequence_output, doc_len, ques_len, option_len, params)
    out = jax.block_until_ready(out)
    assert out.shape == (B, S, HIDDEN)

    ref = duma_ref(sequence_output, doc_len, ques_len, option_len, params)
    np.testing.assert_allclose(np.asarray(out), np.asarray(ref), rtol=2e-3, atol=2e-3)

    print("KERNEL_OK")
</pallas_src>

<mosaic_0001>
module attributes {stable_mosaic.version = 11 : i64} {
  func.func @_duma_kernel(%arg0: memref<64x32xf32, #tpu.memory_space<vmem>>, %arg1: memref<64x32xf32, #tpu.memory_space<vmem>>, %arg2: memref<160x32xf32, #tpu.memory_space<vmem>>, %arg3: memref<8x32xf32, #tpu.memory_space<vmem>>, %arg4: memref<16x128xf32, #tpu.memory_space<vmem>>, %arg5: memref<64x32xf32, #tpu.memory_space<vmem>>, %arg6: memref<32x512xf32, #tpu.memory_space<vmem>>, %arg7: memref<512x64xf32, #tpu.memory_space<vmem>>, %arg8: memref<64x512xf32, #tpu.memory_space<vmem>>, %arg9: memref<512x32xf32, #tpu.memory_space<vmem>>, %arg10: memref<64x64xf32, #tpu.memory_space<vmem>>, %arg11: memref<32x32xf32, #tpu.memory_space<vmem>>) attributes {dimension_semantics = [], scalar_prefetch = 0 : i64, scratch_operands = 0 : i64, tpu.core_type = #tpu.core_type<tc>} {
    %c0 = arith.constant 0 : index
    %c0_0 = arith.constant 0 : index
    %0 = vector.load %arg0[%c0, %c0_0] : memref<64x32xf32, #tpu.memory_space<vmem>>, vector<64x32xf32>
    %c0_1 = arith.constant 0 : index
    %c0_2 = arith.constant 0 : index
    %1 = vector.load %arg1[%c0_1, %c0_2] : memref<64x32xf32, #tpu.memory_space<vmem>>, vector<64x32xf32>
    %c0_3 = arith.constant 0 : index
    %c0_4 = arith.constant 0 : index
    %2 = vector.load %arg2[%c0_3, %c0_4] : memref<160x32xf32, #tpu.memory_space<vmem>>, vector<32x32xf32>
    %cst = arith.constant dense<0.000000e+00> : vector<64x32xf32>
    %3 = tpu.matmul %0, %2, %cst {dimension_numbers = #tpu.dot_dimension_numbers<[1], [0], [0], [1], [0, 0, 1, 1], [], []>} : vector<64x32xf32>, vector<32x32xf32>, vector<64x32xf32> -> vector<64x32xf32>
    %c0_5 = arith.constant 0 : index
    %c0_6 = arith.constant 0 : index
    %4 = vector.load %arg3[%c0_5, %c0_6] : memref<8x32xf32, #tpu.memory_space<vmem>>, vector<1x32xf32>
    %5 = vector.broadcast %4 : vector<1x32xf32> to vector<64x32xf32>
    %6 = arith.addf %3, %5 : vector<64x32xf32>
    %c32 = arith.constant 32 : index
    %c0_7 = arith.constant 0 : index
    %7 = vector.load %arg2[%c32, %c0_7] : memref<160x32xf32, #tpu.memory_space<vmem>>, vector<32x32xf32>
    %cst_8 = arith.constant dense<0.000000e+00> : vector<64x32xf32>
    %8 = tpu.matmul %1, %7, %cst_8 {dimension_numbers = #tpu.dot_dimension_numbers<[1], [0], [0], [1], [0, 0, 1, 1], [], []>} : vector<64x32xf32>, vector<32x32xf32>, vector<64x32xf32> -> vector<64x32xf32>
    %c1 = arith.constant 1 : index
    %c0_9 = arith.constant 0 : index
    %9 = vector.load %arg3[%c1, %c0_9] : memref<8x32xf32, #tpu.memory_space<vmem>>, vector<1x32xf32>
    %10 = vector.broadcast %9 : vector<1x32xf32> to vector<64x32xf32>
    %11 = arith.addf %8, %10 : vector<64x32xf32>
    %c64 = arith.constant 64 : index
    %c0_10 = arith.constant 0 : index
    %12 = vector.load %arg2[%c64, %c0_10] : memref<160x32xf32, #tpu.memory_space<vmem>>, vector<32x32xf32>
    %cst_11 = arith.constant dense<0.000000e+00> : vector<64x32xf32>
    %13 = tpu.matmul %1, %12, %cst_11 {dimension_numbers = #tpu.dot_dimension_numbers<[1], [0], [0], [1], [0, 0, 1, 1], [], []>} : vector<64x32xf32>, vector<32x32xf32>, vector<64x32xf32> -> vector<64x32xf32>
    %c2 = arith.constant 2 : index
    %c0_12 = arith.constant 0 : index
    %14 = vector.load %arg3[%c2, %c0_12] : memref<8x32xf32, #tpu.memory_space<vmem>>, vector<1x32xf32>
    %15 = vector.broadcast %14 : vector<1x32xf32> to vector<64x32xf32>
    %16 = arith.addf %13, %15 : vector<64x32xf32>
    %c0_13 = arith.constant 0 : index
    %c0_14 = arith.constant 0 : index
    %17 = vector.load %arg5[%c0_13, %c0_14] : memref<64x32xf32, #tpu.memory_space<vmem>>, vector<64x32xf32>
    %18 = vector.shape_cast %17 : vector<64x32xf32> to vector<1x64x32xf32>
    %19 = vector.shape_cast %11 : vector<64x32xf32> to vector<4x16x32xf32>
    %20 = vector.shape_cast %16 : vector<64x32xf32> to vector<4x16x32xf32>
    %21 = tpu.concatenate %19, %19, %19, %19 in 1 : vector<4x16x32xf32>, vector<4x16x32xf32>, vector<4x16x32xf32>, vector<4x16x32xf32> -> vector<4x64x32xf32>
    %22 = vector.broadcast %18 : vector<1x64x32xf32> to vector<4x64x32xf32>
    %23 = arith.mulf %21, %22 : vector<4x64x32xf32>
    %24 = tpu.concatenate %20, %20, %20, %20 in 1 : vector<4x16x32xf32>, vector<4x16x32xf32>, vector<4x16x32xf32>, vector<4x16x32xf32> -> vector<4x64x32xf32>
    %25 = vector.broadcast %18 : vector<1x64x32xf32> to vector<4x64x32xf32>
    %26 = arith.mulf %24, %25 : vector<4x64x32xf32>
    %27 = vector.shape_cast %6 : vector<64x32xf32> to vector<4x16x32xf32>
    "tpu.trace_start"() <{level = 10 : i32, message = "rfh,rnh->rfn"}> : () -> ()
    %cst_15 = arith.constant dense<0.000000e+00> : vector<4x16x64xf32>
    %28 = tpu.matmul %27, %23, %cst_15 {dimension_numbers = #tpu.dot_dimension_numbers<[2], [2], [1], [1], [0, 0, 0, 1, 1, 1], [0], [0]>} : vector<4x16x32xf32>, vector<4x64x32xf32>, vector<4x16x64xf32> -> vector<4x16x64xf32>
    "tpu.trace_stop"() : () -> ()
    %c0_16 = arith.constant 0 : index
    %c0_17 = arith.constant 0 : index
    %29 = vector.load %arg4[%c0_16, %c0_17] : memref<16x128xf32, #tpu.memory_space<vmem>>, vector<16x128xf32>
    %30 = tpu.concatenate %29, %29, %29, %29 in 1 : vector<16x128xf32>, vector<16x128xf32>, vector<16x128xf32>, vector<16x128xf32> -> vector<16x512xf32>
    %31 = tpu.concatenate %30, %30, %30, %30 in 0 : vector<16x512xf32>, vector<16x512xf32>, vector<16x512xf32>, vector<16x512xf32> -> vector<64x512xf32>
    %c0_18 = arith.constant 0 : index
    %c0_19 = arith.constant 0 : index
    %32 = vector.load %arg6[%c0_18, %c0_19] : memref<32x512xf32, #tpu.memory_space<vmem>>, vector<32x512xf32>
    %cst_20 = arith.constant dense<0.000000e+00> : vector<64x512xf32>
    %33 = tpu.matmul %6, %32, %cst_20 {dimension_numbers = #tpu.dot_dimension_numbers<[1], [0], [0], [1], [0, 0, 1, 1], [], []>} : vector<64x32xf32>, vector<32x512xf32>, vector<64x512xf32> -> vector<64x512xf32>
    %34 = arith.mulf %33, %31 : vector<64x512xf32>
    %c0_21 = arith.constant 0 : index
    %c0_22 = arith.constant 0 : index
    %35 = vector.load %arg7[%c0_21, %c0_22] : memref<512x64xf32, #tpu.memory_space<vmem>>, vector<512x64xf32>
    %cst_23 = arith.constant dense<0.000000e+00> : vector<64x64xf32>
    %36 = tpu.matmul %34, %35, %cst_23 {dimension_numbers = #tpu.dot_dimension_numbers<[1], [0], [0], [1], [0, 0, 1, 1], [], []>} : vector<64x512xf32>, vector<512x64xf32>, vector<64x64xf32> -> vector<64x64xf32>
    %37 = vector.shape_cast %36 : vector<64x64xf32> to vector<4x16x64xf32>
    %38 = arith.addf %28, %37 : vector<4x16x64xf32>
    %cst_24 = arith.constant 0.353553385 : f32
    %39 = vector.broadcast %cst_24 : f32 to vector<4x16x64xf32>
    %40 = arith.mulf %38, %39 : vector<4x16x64xf32>
    %cst_25 = arith.constant dense<0xFF800000> : vector<4x16xf32>
    %41 = vector.multi_reduction <maximumf>, %40, %cst_25 [2] : vector<4x16x64xf32> to vector<4x16xf32>
    %42 = vector.shape_cast %41 : vector<4x16xf32> to vector<4x16x1xf32>
    %43 = vector.broadcast %42 : vector<4x16x1xf32> to vector<4x16x64xf32>
    %44 = arith.subf %40, %43 : vector<4x16x64xf32>
    %45 = math.exp %44 : vector<4x16x64xf32>
    %46 = vector.shape_cast %45 : vector<4x16x64xf32> to vector<64x64xf32>
    %c0_26 = arith.constant 0 : index
    %c0_27 = arith.constant 0 : index
    %47 = vector.load %arg10[%c0_26, %c0_27] : memref<64x64xf32, #tpu.memory_space<vmem>>, vector<64x64xf32>
    %cst_28 = arith.constant dense<0.000000e+00> : vector<64x64xf32>
    %48 = tpu.matmul %46, %47, %cst_28 {dimension_numbers = #tpu.dot_dimension_numbers<[1], [0], [0], [1], [0, 0, 1, 1], [], []>} : vector<64x64xf32>, vector<64x64xf32>, vector<64x64xf32> -> vector<64x64xf32>
    %49 = tpu.reciprocal %48 {approx = true} : vector<64x64xf32> -> vector<64x64xf32>
    %50 = arith.mulf %46, %49 : vector<64x64xf32>
    %51 = vector.shape_cast %50 : vector<64x64xf32> to vector<4x16x64xf32>
    "tpu.trace_start"() <{level = 10 : i32, message = "rfn,rnh->rfh"}> : () -> ()
    %cst_29 = arith.constant dense<0.000000e+00> : vector<4x16x32xf32>
    %52 = tpu.matmul %51, %26, %cst_29 {dimension_numbers = #tpu.dot_dimension_numbers<[2], [1], [1], [2], [0, 0, 0, 1, 1, 2], [0], [0]>} : vector<4x16x64xf32>, vector<4x64x32xf32>, vector<4x16x32xf32> -> vector<4x16x32xf32>
    "tpu.trace_stop"() : () -> ()
    %c0_30 = arith.constant 0 : index
    %c0_31 = arith.constant 0 : index
    %53 = vector.load %arg8[%c0_30, %c0_31] : memref<64x512xf32, #tpu.memory_space<vmem>>, vector<64x512xf32>
    %cst_32 = arith.constant dense<0.000000e+00> : vector<64x512xf32>
    %54 = tpu.matmul %50, %53, %cst_32 {dimension_numbers = #tpu.dot_dimension_numbers<[1], [0], [0], [1], [0, 0, 1, 1], [], []>} : vector<64x64xf32>, vector<64x512xf32>, vector<64x512xf32> -> vector<64x512xf32>
    %55 = arith.mulf %54, %31 : vector<64x512xf32>
    %c0_33 = arith.constant 0 : index
    %c0_34 = arith.constant 0 : index
    %56 = vector.load %arg9[%c0_33, %c0_34] : memref<512x32xf32, #tpu.memory_space<vmem>>, vector<512x32xf32>
    %cst_35 = arith.constant dense<0.000000e+00> : vector<64x32xf32>
    %57 = tpu.matmul %55, %56, %cst_35 {dimension_numbers = #tpu.dot_dimension_numbers<[1], [0], [0], [1], [0, 0, 1, 1], [], []>} : vector<64x512xf32>, vector<512x32xf32>, vector<64x32xf32> -> vector<64x32xf32>
    %58 = vector.shape_cast %52 : vector<4x16x32xf32> to vector<64x32xf32>
    %59 = arith.addf %58, %57 : vector<64x32xf32>
    %c96 = arith.constant 96 : index
    %c0_36 = arith.constant 0 : index
    %60 = vector.load %arg2[%c96, %c0_36] : memref<160x32xf32, #tpu.memory_space<vmem>>, vector<32x32xf32>
    %cst_37 = arith.constant dense<0.000000e+00> : vector<64x32xf32>
    %61 = tpu.matmul %59, %60, %cst_37 {dimension_numbers = #tpu.dot_dimension_numbers<[1], [0], [0], [1], [0, 0, 1, 1], [], []>} : vector<64x32xf32>, vector<32x32xf32>, vector<64x32xf32> -> vector<64x32xf32>
    %c3 = arith.constant 3 : index
    %c0_38 = arith.constant 0 : index
    %62 = vector.load %arg3[%c3, %c0_38] : memref<8x32xf32, #tpu.memory_space<vmem>>, vector<1x32xf32>
    %63 = vector.broadcast %62 : vector<1x32xf32> to vector<64x32xf32>
    %64 = arith.addf %61, %63 : vector<64x32xf32>
    %65 = math.tanh %64 : vector<64x32xf32>
    %66 = vector.extract_strided_slice %65 {offsets = [0, 0], sizes = [16, 32], strides = [1, 1]} : vector<64x32xf32> to vector<16x32xf32>
    %67 = vector.extract_strided_slice %65 {offsets = [32, 0], sizes = [16, 32], strides = [1, 1]} : vector<64x32xf32> to vector<16x32xf32>
    %68 = tpu.concatenate %66, %67 in 0 : vector<16x32xf32>, vector<16x32xf32> -> vector<32x32xf32>
    %69 = vector.extract_strided_slice %65 {offsets = [16, 0], sizes = [16, 32], strides = [1, 1]} : vector<64x32xf32> to vector<16x32xf32>
    %70 = vector.extract_strided_slice %65 {offsets = [48, 0], sizes = [16, 32], strides = [1, 1]} : vector<64x32xf32> to vector<16x32xf32>
    %71 = tpu.concatenate %69, %70 in 0 : vector<16x32xf32>, vector<16x32xf32> -> vector<32x32xf32>
    %c128 = arith.constant 128 : index
    %c0_39 = arith.constant 0 : index
    %72 = vector.load %arg2[%c128, %c0_39] : memref<160x32xf32, #tpu.memory_space<vmem>>, vector<32x32xf32>
    %cst_40 = arith.constant dense<0.000000e+00> : vector<32x32xf32>
    %73 = tpu.matmul %68, %72, %cst_40 {dimension_numbers = #tpu.dot_dimension_numbers<[1], [0], [0], [1], [0, 0, 1, 1], [], []>} : vector<32x32xf32>, vector<32x32xf32>, vector<32x32xf32> -> vector<32x32xf32>
    %c4 = arith.constant 4 : index
    %c0_41 = arith.constant 0 : index
    %74 = vector.load %arg3[%c4, %c0_41] : memref<8x32xf32, #tpu.memory_space<vmem>>, vector<1x32xf32>
    %75 = vector.broadcast %74 : vector<1x32xf32> to vector<32x32xf32>
    %76 = arith.addf %73, %75 : vector<32x32xf32>
    %77 = arith.addf %76, %71 : vector<32x32xf32>
    %cst_42 = arith.constant dense<0.000000e+00> : vector<32xf32>
    %78 = vector.multi_reduction <add>, %77, %cst_42 [1] : vector<32x32xf32> to vector<32xf32>
    %79 = vector.shape_cast %78 : vector<32xf32> to vector<32x1xf32>
    %cst_43 = arith.constant 3.200000e+01 : f32
    %80 = vector.broadcast %cst_43 : f32 to vector<32x1xf32>
    %81 = arith.divf %79, %80 : vector<32x1xf32>
    %82 = vector.broadcast %81 : vector<32x1xf32> to vector<32x32xf32>
    %83 = arith.subf %77, %82 : vector<32x32xf32>
    %84 = arith.mulf %83, %83 : vector<32x32xf32>
    %cst_44 = arith.constant dense<0.000000e+00> : vector<32xf32>
    %85 = vector.multi_reduction <add>, %84, %cst_44 [1] : vector<32x32xf32> to vector<32xf32>
    %86 = vector.shape_cast %85 : vector<32xf32> to vector<32x1xf32>
    %cst_45 = arith.constant 3.200000e+01 : f32
    %87 = vector.broadcast %cst_45 : f32 to vector<32x1xf32>
    %88 = arith.divf %86, %87 : vector<32x1xf32>
    %89 = vector.broadcast %81 : vector<32x1xf32> to vector<32x32xf32>
    %90 = arith.subf %77, %89 : vector<32x32xf32>
    %cst_46 = arith.constant 9.99999996E-13 : f32
    %91 = vector.broadcast %cst_46 : f32 to vector<32x1xf32>
    %92 = arith.addf %88, %91 : vector<32x1xf32>
    %93 = math.rsqrt %92 : vector<32x1xf32>
    %94 = vector.broadcast %93 : vector<32x1xf32> to vector<32x32xf32>
    %95 = arith.mulf %90, %94 : vector<32x32xf32>
    %c5 = arith.constant 5 : index
    %c0_47 = arith.constant 0 : index
    %96 = vector.load %arg3[%c5, %c0_47] : memref<8x32xf32, #tpu.memory_space<vmem>>, vector<1x32xf32>
    %97 = vector.broadcast %96 : vector<1x32xf32> to vector<32x32xf32>
    %98 = arith.mulf %95, %97 : vector<32x32xf32>
    %c6 = arith.constant 6 : index
    %c0_48 = arith.constant 0 : index
    %99 = vector.load %arg3[%c6, %c0_48] : memref<8x32xf32, #tpu.memory_space<vmem>>, vector<1x32xf32>
    %100 = vector.broadcast %99 : vector<1x32xf32> to vector<32x32xf32>
    %101 = arith.addf %98, %100 : vector<32x32xf32>
    %c96_49 = arith.constant 96 : index
    %c0_50 = arith.constant 0 : index
    %102 = vector.load %arg2[%c96_49, %c0_50] : memref<160x32xf32, #tpu.memory_space<vmem>>, vector<32x32xf32>
    %cst_51 = arith.constant dense<0.000000e+00> : vector<32x32xf32>
    %103 = tpu.matmul %101, %102, %cst_51 {dimension_numbers = #tpu.dot_dimension_numbers<[1], [0], [0], [1], [0, 0, 1, 1], [], []>} : vector<32x32xf32>, vector<32x32xf32>, vector<32x32xf32> -> vector<32x32xf32>
    %c3_52 = arith.constant 3 : index
    %c0_53 = arith.constant 0 : index
    %104 = vector.load %arg3[%c3_52, %c0_53] : memref<8x32xf32, #tpu.memory_space<vmem>>, vector<1x32xf32>
    %105 = vector.broadcast %104 : vector<1x32xf32> to vector<32x32xf32>
    %106 = arith.addf %103, %105 : vector<32x32xf32>
    %107 = math.tanh %106 : vector<32x32xf32>
    %c0_54 = arith.constant 0 : index
    %c0_55 = arith.constant 0 : index
    %108 = vector.load %arg11[%c0_54, %c0_55] : memref<32x32xf32, #tpu.memory_space<vmem>>, vector<32x32xf32>
    tpu.vector_store %arg11[%c0_54, %c0_55], %107 {strides = array<i32>} : memref<32x32xf32, #tpu.memory_space<vmem>>, vector<32x32xf32>,
    return
  }
}

</mosaic_0001>

<bundles_post_ra>
// kernel: duma_forward.1
= control target key start
LH: loop header
LB: loop body
LE: loop exit
PB: predicated region body
PF: predicated region fallthrough
CT: control target
= control target key end

     0   :  { %16 = vsyncpa [#allocation3], 0  ;;  %s5501_s0 = inlined_call_operand.vmem [shape: f32[64,32], index: 0, kind: input, shape index: {}]   ;;  %s5502_s1 = inlined_call_operand.vmem [shape: f32[64,32], index: 1, kind: input, shape index: {}]   ;;  %s5503_s2 = inlined_call_operand.vmem [shape: f32[160,32], index: 2, kind: input, shape index: {}]   ;;  %s5504_s3 = inlined_call_operand.vmem [shape: f32[8,32], index: 3, kind: input, shape index: {}]   ;;  %s5505_s4 = inlined_call_operand.vmem [shape: f32[16,128], index: 4, kind: input, shape index: {}]   ;;  %s5506_s5 = inlined_call_operand.vmem [shape: f32[64,32], index: 5, kind: input, shape index: {}]   ;;  %s5507_s6 = inlined_call_operand.vmem [shape: f32[32,512], index: 6, kind: input, shape index: {}]   ;;  %s5508_s7 = inlined_call_operand.vmem [shape: f32[512,64], index: 7, kind: input, shape index: {}]   ;;  %s5509_s8 = inlined_call_operand.vmem [shape: f32[64,512], index: 8, kind: input, shape index: {}]   ;;  %s5510_s9 = inlined_call_operand.vmem [shape: f32[512,32], index: 9, kind: input, shape index: {}]   ;;  %s5511_s10 = inlined_call_operand.hbm [shape: f32[64,64], index: 10, kind: input, shape index: {}]   ;;  %s5512_s11 = inlined_call_operand.hbm [shape: f32[32,32], index: 11, kind: output, shape index: {}]  }
   0x1   :  { %17 = vsyncpa [#allocation4], 0  ;;  %s3979_s17 = smov [#allocation2]  }
   0x2   :  { %s43_s18 = sshll.u32 %s3979_s17, 4  ;;  %s44_s18 = int_to_ptr.vmem [resolvable:$true] %s43_s18 }
   0x3   :  { %s3943_s19 = scalar_lea.vmem %s44_s18, 1024  ;;  %p3948_p1 = scmp.lt.s32.totalorder %s44_s18, %s44_s18 }
   0x4   :  { %p3944_p0 = scmp.ne.s32.totalorder %s44_s18, %s3943_s19  ;;  %p3949_p2 = scmp.lt.s32.totalorder %s3943_s19, %s3943_s19 }
   0x6   :  { %p3950_p3 = por %p3949_p2, %p3948_p1 }
   0x8   :  { %p3951_p4 = pnand %p3950_p3, %p3944_p0 }
   0xa   :  { %3954 = shalt.err (!%p3951_p4)
}
   0xb   :  { %s3980_s20 = smov 128   ;;  %s3981_s21 = smov 8  }
   0xc   :  { %49 = dma.hbm_to_vmem [thread:$0]  %s5511_s10, 1024, %s44_s18, [#allocation3], %s3980_s20, %s3980_s20, %s3981_s21  }
   0xd   :  { %3975 = dma.done.wait [#allocation3], 1024  }
   0xe   :  { %3976 = vsyncadd [#allocation3], 4294966272  ;;  %vm78_vm0 = vcmask 261120   ;;  %v72_v0 = vld [vmem:[%s5503_s2 + $0x18] sm:$0xff]  ;;  %v71_v1 = vld [vmem:[%s5503_s2 + $0x10] sm:$0xff]  ;;  %v5513_v44 = vmov 0.0  }
   0xf   :  { %3576 = vmatprep.subr.mxu0 %v72_v0  ;;  %v53_v2 = vld [vmem:[%s5501_s0] sm:$0xff]  ;;  %v70_v3 = vld [vmem:[%s5503_s2 + $0x8] sm:$0xff]  ;;  %v211_v5 = vld [vmem:[%s5503_s2 + $0x38] sm:$0xff]  ;;  %vm1510_vm1 = vcmask 523264  }
  0x10   :  { %3577 = vmatpush3.msra.mxu0 %v72_v0  ;;  %3584 = vmatprep.mubr.msk.f32.mxu0 %vm78_vm0, %v53_v2  ;;  %v69_v4 = vld [vmem:[%s5503_s2] sm:$0xff]  ;;  %v210_v6 = vld [vmem:[%s5503_s2 + $0x30] sm:$0xff]  ;;  %v54_v7 = vld [vmem:[%s5501_s0 + $0x8] sm:$0xff] }
  0x11   :  { %3578 = vmatprep.subr.mxu0 %v71_v1  ;;  %3596 = vmatprep.subr.mxu1 %v211_v5  ;;  %v349_v8 = vld [vmem:[%s5503_s2 + $0x58] sm:$0xff]  ;;  %v55_v9 = vld [vmem:[%s5501_s0 + $0x10] sm:$0xff]  ;;  %v209_v11 = vld [vmem:[%s5503_s2 + $0x28] sm:$0xff] }
  0x12   :  { %3579 = vmatpush3.msra.mxu0 %v71_v1  ;;  %3597 = vmatpush3.msra.mxu1 %v211_v5  ;;  %v348_v10 = vld [vmem:[%s5503_s2 + $0x50] sm:$0xff]  ;;  %v56_v12 = vld [vmem:[%s5501_s0 + $0x18] sm:$0xff]  ;;  %v347_v13 = vld [vmem:[%s5503_s2 + $0x48] sm:$0xff] }
  0x13   :  { %3580 = vmatprep.subr.mxu0 %v70_v3  ;;  %3598 = vmatprep.subr.mxu1 %v210_v6  ;;  %v57_v14 = vld [vmem:[%s5501_s0 + $0x20] sm:$0xff]  ;;  %v58_v18 = vld [vmem:[%s5501_s0 + $0x28] sm:$0xff]  ;;  %v59_v20 = vld [vmem:[%s5501_s0 + $0x30] sm:$0xff] }
  0x14   :  { %3581 = vmatpush3.msra.mxu0 %v70_v3  ;;  %3599 = vmatpush3.msra.mxu1 %v210_v6  ;;  %v208_v15 = vld [vmem:[%s5503_s2 + $0x20] sm:$0xff]  ;;  %v62_v19 = vld [vmem:[%s5502_s1 + $0x8] sm:$0xff]  ;;  %v63_v22 = vld [vmem:[%s5502_s1 + $0x10] sm:$0xff] }
  0x15   :  { %3582 = vmatprep.subr.mxu0 %v69_v4  ;;  %3600 = vmatprep.subr.mxu1 %v209_v11  ;;  %v61_v16 = vld [vmem:[%s5502_s1] sm:$0xff]  ;;  %v547_v21 = vld [vmem:[%s5507_s6 + $0x68] sm:$0xff]  ;;  %v549_v24 = vld [vmem:[%s5507_s6 + $0x78] sm:$0xff] }
  0x16   :  { %3583 = vmatpush3.msra.mxu0 %v69_v4  ;;  %3601 = vmatpush3.msra.mxu1 %v209_v11  ;;  %v346_v17 = vld [vmem:[%s5503_s2 + $0x40] sm:$0xff]  ;;  %v60_v25 = vld [vmem:[%s5501_s0 + $0x38] sm:$0xff]  ;;  %v543_v27 = vld [vmem:[%s5507_s6 + $0x48] sm:$0xff] }
  0x17   :  { %3585 = vmatmul.mubr.msk.f32.vlgmr.msra.gmra.mxu0 %vm78_vm0, %v54_v7  ;;  %3616 = vmatprep.subr.mxu0 %v349_v8  ;;  %v546_v23 = vld [vmem:[%s5507_s6 + $0x60] sm:$0xff]  ;;  %v64_v26 = vld [vmem:[%s5502_s1 + $0x18] sm:$0xff]  ;;  %v539_v30 = vld [vmem:[%s5507_s6 + $0x28] sm:$0xff] }
  0x18   :  { %3587 = vmatprep.mubr.msk.f32.mxu0 %vm78_vm0, %v55_v9  ;;  %3617 = vmatpush3.msra.mxu0 %v349_v8  ;;  %v542_v28 = vld [vmem:[%s5507_s6 + $0x40] sm:$0xff]  ;;  %v66_v31 = vld [vmem:[%s5502_s1 + $0x28] sm:$0xff]  ;;  %v548_v32 = vld [vmem:[%s5507_s6 + $0x70] sm:$0xff] }
  0x19   :  { %3618 = vmatprep.subr.mxu0 %v348_v10  ;;  %3602 = vmatprep.subr.mxu1 %v208_v15  ;;  %v65_v29 = vld [vmem:[%s5502_s1 + $0x20] sm:$0xff]  ;;  %v545_v33 = vld [vmem:[%s5507_s6 + $0x58] sm:$0xff]  ;;  %v544_v35 = vld [vmem:[%s5507_s6 + $0x50] sm:$0xff] }
  0x1a   :  { %3619 = vmatpush3.msra.mxu0 %v348_v10  ;;  %3603 = vmatpush3.msra.mxu1 %v208_v15  ;;  %v538_v34 = vld [vmem:[%s5507_s6 + $0x20] sm:$0xff]  ;;  %v67_v36 = vld [vmem:[%s5502_s1 + $0x30] sm:$0xff]  ;;  %v68_v37 = vld [vmem:[%s5502_s1 + $0x38] sm:$0xff] }
  0x1b   :  { %3588 = vmatmul.mubr.msk.f32.gmra.mxu0 %vm78_vm0, %v56_v12  ;;  %3620 = vmatprep.subr.mxu0 %v347_v13  ;;  %v541_v38 = vld [vmem:[%s5507_s6 + $0x38] sm:$0xff]  ;;  %v535_v39 = vld [vmem:[%s5507_s6 + $0x8] sm:$0xff]  ;;  %v534_v40 = vld [vmem:[%s5507_s6] sm:$0xff] }
  0x1c   :  { %3590 = vmatprep.mubr.msk.f32.mxu0 %vm78_vm0, %v57_v14  ;;  %3621 = vmatpush3.msra.mxu0 %v347_v13  ;;  %v540_v41 = vld [vmem:[%s5507_s6 + $0x30] sm:$0xff]  ;;  %v537_v42 = vld [vmem:[%s5507_s6 + $0x18] sm:$0xff]  ;;  %v4217_v48 = vld [vmem:[%s5504_s3] ss:$0 sm:$0xff] }
  0x1d   :  { %3604 = vmatprep.mubr.msk.f32.mxu1 %vm78_vm0, %v61_v16  ;;  %3622 = vmatprep.subr.mxu0 %v346_v17  ;;  %v536_v43 = vld [vmem:[%s5507_s6 + $0x10] sm:$0xff]  ;;  %v863_v45 = vld [vmem:[%s5508_s7 + $0xf8] sm:$0xff]  ;;  %v4254_v62 = vld [vmem:[%s5504_s3 + $0x1] ss:$0 sm:$0xff] }
  0x1e   :  { %3605 = vmatmul.mubr.msk.f32.vlgmr.msra.gmra.mxu1 %vm78_vm0, %v62_v19  ;;  %3623 = vmatpush3.msra.mxu0 %v346_v17  ;;  %v895_v46 = vld [vmem:[%s5508_s7 + $0x1f8] sm:$0xff]  ;;  %v862_v54 = vld [vmem:[%s5508_s7 + $0xf0] sm:$0xff]  ;;  %v861_v63 = vld [vmem:[%s5508_s7 + $0xe8] sm:$0xff] }
  0x1f   :  { %3591 = vmatmul.mubr.msk.f32.gmra.mxu0 %vm78_vm0, %v58_v18  ;;  %598 = vmatprep.subr.mxu1 %v547_v21  ;;  %v847_v52 = vld [vmem:[%s5508_s7 + $0x78] sm:$0xff]  ;;  %v894_v55 = vld [vmem:[%s5508_s7 + $0x1f0] sm:$0xff]  ;;  %v893_v0 = vld [vmem:[%s5508_s7 + $0x1e8] sm:$0xff] }
  0x20   :  { %3593 = vmatprep.mubr.msk.f32.mxu0 %vm78_vm0, %v59_v20  ;;  %3607 = vmatprep.mubr.msk.f32.mxu1 %vm78_vm0, %v63_v22  ;;  %v879_v53 = vld [vmem:[%s5508_s7 + $0x178] sm:$0xff]  ;;  %v846_v59 = vld [vmem:[%s5508_s7 + $0x70] sm:$0xff]  ;;  %v845_v6 = vld [vmem:[%s5508_s7 + $0x68] sm:$0xff] }
  0x21   :  { %599 = vmatpush1.msra.mxu1 %v546_v23  ;;  %711 = vmatprep.subr.mxu0 %v549_v24  ;;  %v878_v60 = vld [vmem:[%s5508_s7 + $0x170] sm:$0xff]  ;;  %v877_v7 = vld [vmem:[%s5508_s7 + $0x168] sm:$0xff]  ;;  %v860_v8 = vld [vmem:[%s5508_s7 + $0xe0] sm:$0xff] }
  0x22   :  { %3608 = vmatmul.mubr.msk.f32.gmra.mxu1 %vm78_vm0, %v64_v26  ;;  %600 = vmatprep.subr.mxu1 %v543_v27  ;;  %v892_v9 = vld [vmem:[%s5508_s7 + $0x1e0] sm:$0xff]  ;;  %v859_v15 = vld [vmem:[%s5508_s7 + $0xd8] sm:$0xff]  ;;  %v890_v23 = vld [vmem:[%s5508_s7 + $0x1d0] sm:$0xff] }
  0x23   :  { %3594 = vmatmul.mubr.msk.f32.gmra.mxu0 %vm78_vm0, %v60_v25  ;;  %601 = vmatpush1.msra.mxu1 %v542_v28  ;;  %v844_v12 = vld [vmem:[%s5508_s7 + $0x60] sm:$0xff]  ;;  %v875_v20 = vld [vmem:[%s5508_s7 + $0x158] sm:$0xff]  ;;  %v842_v28 = vld [vmem:[%s5508_s7 + $0x50] sm:$0xff] }
  0x24   :  { %3624 = vmatprep.mubr.msk.f32.mxu0 %vm78_vm0, %v61_v16  ;;  %3610 = vmatprep.mubr.msk.f32.mxu1 %vm78_vm0, %v65_v29  ;;  %v876_v13 = vld [vmem:[%s5508_s7 + $0x160] sm:$0xff]  ;;  %v891_v16 = vld [vmem:[%s5508_s7 + $0x1d8] sm:$0xff] }
  0x25   :  { %602 = vmatprep.subr.mxu1 %v539_v30  ;;  %v4345_v24 = vld [vmem:[%s5504_s3 + $0x2] ss:$0 sm:$0xff] }
  0x26   :  { %3611 = vmatmul.mubr.msk.f32.gmra.mxu1 %vm78_vm0, %v66_v31 }
  0x27   :  { %3625 = vmatmul.mubr.msk.f32.vlgmr.msra.gmra.mxu0 %vm78_vm0, %v62_v19  ;;  %603 = vmatpush1.msra.mxu1 %v538_v34  ;;  %v843_v19 = vld [vmem:[%s5508_s7 + $0x58] sm:$0xff] }
  0x28   :  { %3627 = vmatprep.mubr.msk.f32.mxu0 %vm78_vm0, %v63_v22  ;;  %712 = vmatpush1.msra.mxu0 %v548_v32  ;;  %v858_v22 = vld [vmem:[%s5508_s7 + $0xd0] sm:$0xff]  ;;  %v889_v32 = vld [vmem:[%s5508_s7 + $0x1c8] sm:$0xff] }
  0x29   :  { %713 = vmatprep.subr.mxu0 %v545_v33  ;;  %3613 = vmatprep.mubr.msk.f32.mxu1 %vm78_vm0, %v67_v36 }
  0x2a   :  { %714 = vmatpush1.msra.mxu0 %v544_v35  ;;  %3614 = vmatmul.mubr.msk.f32.gmra.mxu1 %vm78_vm0, %v68_v37 }
  0x2b   :  { %3628 = vmatmul.mubr.msk.f32.gmra.mxu0 %vm78_vm0, %v64_v26  ;;  %715 = vmatprep.subr.mxu0 %v541_v38 }
  0x2c   :  { %3630 = vmatprep.mubr.msk.f32.mxu0 %vm78_vm0, %v65_v29  ;;  %604 = vmatprep.subr.mxu1 %v535_v39  ;;  %v874_v29 = vld [vmem:[%s5508_s7 + $0x150] sm:$0xff]  ;;  %v856_v39 = vld [vmem:[%s5508_s7 + $0xc0] sm:$0xff] }
  0x2d   :  { %716 = vmatpush1.msra.mxu0 %v540_v41  ;;  %605 = vmatpush1.msra.mxu1 %v534_v40  ;;  %v888_v40 = vld [vmem:[%s5508_s7 + $0x1c0] sm:$0xff] }
  0x2e   :  { %717 = vmatprep.subr.mxu0 %v537_v42  ;;  %638 = vmatprep.mubr.f32.mxu1 %v5513_v44 }
  0x2f   :  { %3631 = vmatmul.mubr.msk.f32.gmra.mxu0 %vm78_vm0, %v66_v31  ;;  %3228 = vmatprep.subr.mxu1 %v863_v45  ;;  %v857_v31 = vld [vmem:[%s5508_s7 + $0xc8] sm:$0xff]  ;;  %v872_v45 = vld [vmem:[%s5508_s7 + $0x140] sm:$0xff] }
  0x30   :  { %3633 = vmatprep.mubr.msk.f32.mxu0 %vm78_vm0, %v67_v36  ;;  %718 = vmatpush1.msra.mxu0 %v536_v43  ;;  %v841_v36 = vld [vmem:[%s5508_s7 + $0x48] sm:$0xff]  ;;  %v840_v43 = vld [vmem:[%s5508_s7 + $0x40] sm:$0xff] }
  0x31   :  { %3284 = vmatprep.subr.mxu0 %v895_v46  ;;  %v855_v46 = vld [vmem:[%s5508_s7 + $0xb8] sm:$0xff] }
  0x33   :  { %3634 = vmatmul.mubr.msk.f32.gmra.mxu0 %vm78_vm0, %v68_v37  ;;  %v873_v37 = vld [vmem:[%s5508_s7 + $0x148] sm:$0xff] }
  0x34   :  { %751 = vmatprep.mubr.f32.mxu0 %v5513_v44 }
  0xd7   :  { %v3586_v47 = vpop.f32.mrf.mxu0 }
  0xd8   :  { %v4241_v57 = vadd.f32 %v3586_v47, %v4217_v48  ;;  %v887_v47 = vld [vmem:[%s5508_s7 + $0x1b8] sm:$0xff] }
  0xd9   :  { %v169_v49 = vpop.f32.mrf.mxu0 }
  0xda   :  { %v4220_v50 = vadd.f32 %v4217_v48, %v169_v49  ;;  %v871_v49 = vld [vmem:[%s5508_s7 + $0x138] sm:$0xff] }
  0xdb   :  { %v3589_v51 = vpop.f32.mrf.mxu0 }
  0xdc   :  { %3084 = vmatmul.mubr.msk.f32.vlgmr.msra.gmra.mxu1 %vm78_vm0, %v4220_v50  ;;  %3092 = vmatmul.mubr.msk.f32.vlgmr.msra.gmra.mxu0 %vm78_vm0, %v4220_v50  ;;  %v4295_v11 = vadd.f32 %v3589_v51, %v4217_v48  ;;  %v854_v51 = vld [vmem:[%s5508_s7 + $0xb0] sm:$0xff] }
  0xdd   :  { %v179_v56 = vpop.f32.mrf.mxu0  ;;  %644 = vmatprep.mubr.f32.mxu1 %v5513_v44  ;;  %757 = vmatprep.mubr.f32.mxu0 %v5513_v44 }
  0xde   :  { %3229 = vmatpush3.msra.mxu1 %v847_v52  ;;  %3285 = vmatpush3.msra.mxu0 %v879_v53  ;;  %v4249_v61 = vpop.f32.mrf.mxu1  ;;  %v4269_v3 = vadd.f32 %v4217_v48, %v179_v56  ;;  %v886_v52 = vld [vmem:[%s5508_s7 + $0x1b0] sm:$0xff]  ;;  %v885_v56 = vld [vmem:[%s5508_s7 + $0x1a8] sm:$0xff] }
  0xdf   :  { %v3592_v58 = vpop.f32.mrf.mxu0  ;;  %3230 = vmatprep.subr.mxu1 %v862_v54  ;;  %3286 = vmatprep.subr.mxu0 %v894_v55  ;;  %v838_v53 = vld [vmem:[%s5508_s7 + $0x30] sm:$0xff]  ;;  %v853_v55 = vld [vmem:[%s5508_s7 + $0xa8] sm:$0xff] }
  0xe0   :  { %3085 = vmatmul.mubr.msk.f32.gmra.mxu1 %vm78_vm0, %v4241_v57  ;;  %3093 = vmatmul.mubr.msk.f32.gmra.mxu0 %vm78_vm0, %v4241_v57  ;;  %v307_v2 = vpop.f32.mrf.mxu1  ;;  %v4348_v26 = vadd.f32 %v3592_v58, %v4217_v48  ;;  %v870_v54 = vld [vmem:[%s5508_s7 + $0x130] sm:$0xff]  ;;  %v837_v58 = vld [vmem:[%s5508_s7 + $0x28] sm:$0xff] }
  0xe1   :  { %650 = vmatprep.mubr.f32.mxu1 %v5513_v44  ;;  %763 = vmatprep.mubr.f32.mxu0 %v5513_v44  ;;  %v189_v1 = vpop.f32.mrf.mxu0  ;;  %v4272_v4 = vadd.f32 %v4254_v62, %v307_v2  ;;  %v851_v2 = vld [vmem:[%s5508_s7 + $0x98] sm:$0xff] }
  0xe2   :  { %3231 = vmatpush3.msra.mxu1 %v846_v59  ;;  %3287 = vmatpush3.msra.mxu0 %v878_v60  ;;  %v4320_v18 = vadd.f32 %v4217_v48, %v189_v1  ;;  %v869_v59 = vld [vmem:[%s5508_s7 + $0x128] sm:$0xff]  ;;  %v852_v60 = vld [vmem:[%s5508_s7 + $0xa0] sm:$0xff] }
  0xe3   :  { %v4274_v5 = vpop.f32.mrf.mxu0  ;;  %3232 = vmatprep.subr.mxu1 %v861_v63  ;;  %3288 = vmatprep.subr.mxu0 %v893_v0  ;;  %v884_v63 = vld [vmem:[%s5508_s7 + $0x1a0] sm:$0xff] }
  0xe4   :  { %3086 = vmatmul.mubr.msk.f32.gmra.mxu1 %vm78_vm0, %v4269_v3  ;;  %3094 = vmatmul.mubr.msk.f32.gmra.mxu0 %vm78_vm0, %v4269_v3  ;;  %v4402_v42 = vadd.f32 %v4274_v5, %v4217_v48  ;;  %v836_v0 = vld [vmem:[%s5508_s7 + $0x20] sm:$0xff]  ;;  %v883_v5 = vld [vmem:[%s5508_s7 + $0x198] sm:$0xff] }
  0xe5   :  { %656 = vmatprep.mubr.f32.mxu1 %v5513_v44  ;;  %769 = vmatprep.mubr.f32.mxu0 %v5513_v44  ;;  %v199_v10 = vpop.f32.mrf.mxu0  ;;  %v868_v1 = vld [vmem:[%s5508_s7 + $0x120] sm:$0xff] }
  0xe6   :  { %3233 = vmatpush3.msra.mxu1 %v845_v6  ;;  %3289 = vmatpush3.msra.mxu0 %v877_v7  ;;  %v4374_v34 = vadd.f32 %v4217_v48, %v199_v10  ;;  %v839_v48 = vld [vmem:[%s5508_s7 + $0x38] sm:$0xff]  ;;  %v882_v10 = vld [vmem:[%s5508_s7 + $0x190] sm:$0xff] }
  0xe7   :  { %3234 = vmatprep.subr.mxu1 %v860_v8  ;;  %3290 = vmatprep.subr.mxu0 %v892_v9  ;;  %v4303_v14 = vpop.f32.mrf.mxu0  ;;  %v835_v6 = vld [vmem:[%s5508_s7 + $0x18] sm:$0xff]  ;;  %v850_v8 = vld [vmem:[%s5508_s7 + $0x90] sm:$0xff]  ;;  %v3609_v9 = vpop.f32.mrf.mxu1 }
  0xe8   :  { %3087 = vmatmul.mubr.msk.f32.gmra.mxu1 %vm78_vm0, %v4295_v11  ;;  %3095 = vmatmul.mubr.msk.f32.gmra.mxu0 %vm78_vm0, %v4295_v11  ;;  %v867_v7 = vld [vmem:[%s5508_s7 + $0x118] sm:$0xff] }
  0xe9   :  { %662 = vmatprep.mubr.f32.mxu1 %v5513_v44  ;;  %775 = vmatprep.mubr.f32.mxu0 %v5513_v44  ;;  %v4317_v17 = vpop.f32.mrf.mxu0 }
  0xea   :  { %3235 = vmatpush3.msra.mxu1 %v844_v12  ;;  %3291 = vmatpush3.msra.mxu0 %v876_v13  ;;  %v4482_v12 = vadd.f32 %v4249_v61, %v4254_v62  ;;  %v834_v13 = vld [vmem:[%s5508_s7 + $0x10] sm:$0xff]  ;;  %v881_v61 = vld [vmem:[%s5508_s7 + $0x188] sm:$0xff] }
  0xeb   :  { %3236 = vmatprep.subr.mxu1 %v859_v15  ;;  %3292 = vmatprep.subr.mxu0 %v891_v16  ;;  %v4328_v21 = vpop.f32.mrf.mxu0  ;;  %v4488_v15 = vadd.f32 %v3609_v9, %v4254_v62  ;;  %v866_v16 = vld [vmem:[%s5508_s7 + $0x110] sm:$0xff] }
  0xec   :  { %3088 = vmatmul.mubr.msk.f32.gmra.mxu1 %vm78_vm0, %v4320_v18  ;;  %3096 = vmatmul.mubr.msk.f32.gmra.mxu0 %vm78_vm0, %v4320_v18 }
  0xed   :  { %668 = vmatprep.mubr.f32.mxu1 %v5513_v44  ;;  %781 = vmatprep.mubr.f32.mxu0 %v5513_v44  ;;  %v431_v25 = vpop.f32.mrf.mxu0 }
  0xee   :  { %3237 = vmatpush3.msra.mxu1 %v843_v19  ;;  %3293 = vmatpush3.msra.mxu0 %v875_v20  ;;  %v4351_v27 = vadd.f32 %v4345_v24, %v431_v25  ;;  %v849_v19 = vld [vmem:[%s5508_s7 + $0x88] sm:$0xff]  ;;  %v467_v20 = vld [vmem:[%s5506_s5 + $0x38] sm:$0xff]  ;;  %v848_v25 = vld [vmem:[%s5508_s7 + $0x80] sm:$0xff] }
  0xef   :  { %3238 = vmatprep.subr.mxu1 %v858_v22  ;;  %3294 = vmatprep.subr.mxu0 %v890_v23  ;;  %v4359_v30 = vpop.f32.mrf.mxu0  ;;  %v833_v22 = vld [vmem:[%s5508_s7 + $0x8] sm:$0xff] }
  0xf0   :  { %3089 = vmatmul.mubr.msk.f32.gmra.mxu1 %vm78_vm0, %v4348_v26  ;;  %3097 = vmatmul.mubr.msk.f32.gmra.mxu0 %vm78_vm0, %v4348_v26  ;;  %v865_v23 = vld [vmem:[%s5508_s7 + $0x108] sm:$0xff] }
  0xf1   :  { %674 = vmatprep.mubr.f32.mxu1 %v5513_v44  ;;  %787 = vmatprep.mubr.f32.mxu0 %v5513_v44  ;;  %v441_v33 = vpop.f32.mrf.mxu0 }
  0xf2   :  { %3239 = vmatpush3.msra.mxu1 %v842_v28  ;;  %3295 = vmatpush3.msra.mxu0 %v874_v29  ;;  %v4377_v35 = vadd.f32 %v4345_v24, %v441_v33  ;;  %v880_v28 = vld [vmem:[%s5508_s7 + $0x180] sm:$0xff]  ;;  %v4524_v33 = vmul.f32 %v467_v20, %v4488_v15 }
  0xf3   :  { %3240 = vmatprep.subr.mxu1 %v857_v31  ;;  %3296 = vmatprep.subr.mxu0 %v889_v32  ;;  %v3635_v38 = vpop.f32.mrf.mxu0  ;;  %v832_v29 = vld [vmem:[%s5508_s7] sm:$0xff]  ;;  %v4518_v31 = vmul.f32 %v467_v20, %v4482_v12 }
  0xf4   :  { %3090 = vmatmul.mubr.msk.f32.gmra.mxu1 %vm78_vm0, %v4374_v34  ;;  %3098 = vmatmul.mubr.msk.f32.gmra.mxu0 %vm78_vm0, %v4374_v34  ;;  %v4396_v41 = vadd.f32 %v3635_v38, %v4345_v24  ;;  %v864_v32 = vld [vmem:[%s5508_s7 + $0x100] sm:$0xff]  ;;  %v4532_v38 = vadd.f32 %v4303_v14, %v4345_v24  ;;  %v437_v14 = vadd.f32 %v4328_v21, %v4345_v24 }
  0xf5   :  { %680 = vmatprep.mubr.f32.mxu1 %v5513_v44  ;;  %793 = vmatprep.mubr.f32.mxu0 %v5513_v44  ;;  %v4573_v21 = vld [vmem:[%s5506_s5 + $0x20] sm:$0xff] }
  0xf6   :  { %3241 = vmatpush3.msra.mxu1 %v841_v36  ;;  %3297 = vmatpush3.msra.mxu0 %v873_v37  ;;  %v317_v36 = vpop.f32.mrf.mxu1 }
  0xf7   :  { %3242 = vmatprep.subr.mxu1 %v856_v39  ;;  %3298 = vmatprep.subr.mxu0 %v888_v40  ;;  %v4536_v39 = vadd.f32 %v4345_v24, %v4317_v17 }
  0xf8   :  { %3091 = vmatmul.mubr.msk.f32.gmra.mxu1 %vm78_vm0, %v4402_v42  ;;  %3099 = vmatmul.mubr.msk.f32.gmra.mxu0 %vm78_vm0, %v4402_v42  ;;  %v3612_v37 = vpop.f32.mrf.mxu1 }
  0xf9   :  { %3243 = vmatpush3.msra.mxu1 %v840_v43  ;;  %3299 = vmatpush3.msra.mxu0 %v872_v45  ;;  %v4539_v40 = vadd.f32 %v3612_v37, %v4254_v62  ;;  %v4546_v45 = vld [vmem:[%s5506_s5 + $0x30] sm:$0xff] }
  0xfa   :  { %3244 = vmatprep.subr.mxu1 %v855_v46  ;;  %3300 = vmatprep.subr.mxu0 %v887_v47  ;;  %v4541_v43 = vpop.f32.mrf.mxu1  ;;  %v4549_v46 = vmul.f32 %v467_v20, %v4532_v38  ;;  %v4555_v17 = vmul.f32 %v4546_v45, %v4536_v39  ;;  %v4630_v9 = vmul.f32 %v4546_v45, %v4377_v35 }
  0xfb   :  { %3245 = vmatpush3.msra.mxu1 %v839_v48  ;;  %3301 = vmatpush3.msra.mxu0 %v871_v49  ;;  %v4558_v48 = vmul.f32 %v467_v20, %v4539_v40 }
  0xfc   :  { %3246 = vmatprep.subr.mxu1 %v854_v51  ;;  %3302 = vmatprep.subr.mxu0 %v886_v52  ;;  %v3615_v47 = vpop.f32.mrf.mxu1  ;;  %v447_v51 = vadd.f32 %v4359_v30, %v4345_v24  ;;  %v4568_v52 = vld [vmem:[%s5506_s5 + $0x28] sm:$0xff]  ;;  %v4585_v30 = vld [vmem:[%s5506_s5 + $0x10] sm:$0xff] }
  0xfd   :  { %3247 = vmatpush3.msra.mxu1 %v838_v53  ;;  %3303 = vmatpush3.msra.mxu0 %v870_v54  ;;  %v4561_v49 = vadd.f32 %v3615_v47, %v4254_v62  ;;  %v4578_v53 = vld [vmem:[%s5506_s5 + $0x18] sm:$0xff]  ;;  %v4580_v54 = vmul.f32 %v467_v20, %v437_v14  ;;  %v4685_v47 = vld [vmem:[%s5505_s4] sm:$0xff] }
  0xfe   :  { %3248 = vmatprep.subr.mxu1 %v853_v55  ;;  %3304 = vmatprep.subr.mxu0 %v885_v56  ;;  %v4590_v55 = vld [vmem:[%s5506_s5 + $0x8] sm:$0xff]  ;;  %v4595_v56 = vld [vmem:[%s5506_s5] sm:$0xff] }
  0xff   :  { %3249 = vmatpush3.msra.mxu1 %v837_v58  ;;  %3305 = vmatpush3.msra.mxu0 %v869_v59  ;;  %v4599_v58 = vmul.f32 %v4546_v45, %v4351_v27  ;;  %v4602_v59 = vmul.f32 %v4568_v52, %v437_v14 }
 0x100   :  { %3250 = vmatprep.subr.mxu1 %v852_v60  ;;  %3306 = vmatprep.subr.mxu0 %v884_v63  ;;  %v4606_v60 = vmul.f32 %v4573_v21, %v4351_v27  ;;  %v4609_v63 = vmul.f32 %v4578_v53, %v437_v14 }
 0x101   :  { %3251 = vmatpush3.msra.mxu1 %v836_v0  ;;  %3307 = vmatpush3.msra.mxu0 %v868_v1  ;;  %v451_v0 = vpop.f32.mrf.mxu0  ;;  %v4613_v1 = vmul.f32 %v4585_v30, %v4351_v27 }
 0x102   :  { %3252 = vmatprep.subr.mxu1 %v851_v2  ;;  %3308 = vmatprep.subr.mxu0 %v883_v5  ;;  %v4616_v2 = vmul.f32 %v4590_v55, %v437_v14  ;;  %v4620_v5 = vmul.f32 %v4595_v56, %v4351_v27  ;;  %v4640_v27 = vmul.f32 %v4578_v53, %v447_v51 }
 0x103   :  { %3253 = vmatpush3.msra.mxu1 %v835_v6  ;;  %3309 = vmatpush3.msra.mxu0 %v867_v7  ;;  %v452_v6 = vadd.f32 %v4345_v24, %v451_v0  ;;  %v4624_v7 = vmul.f32 %v467_v20, %v4561_v49  ;;  %v4644_v24 = vmul.f32 %v4585_v30, %v4377_v35 }
 0x104   :  { %3254 = vmatprep.subr.mxu1 %v850_v8  ;;  %3310 = vmatprep.subr.mxu0 %v882_v10  ;;  %v4626_v8 = vmul.f32 %v467_v20, %v447_v51  ;;  %v4633_v10 = vmul.f32 %v4568_v52, %v447_v51 }
 0x105   :  { %3255 = vmatpush3.msra.mxu1 %v834_v13  ;;  %3311 = vmatpush3.msra.mxu0 %v866_v16  ;;  %v4637_v13 = vmul.f32 %v4573_v21, %v4377_v35  ;;  %5523 = vst [vmem:[#allocation8_spill] sm:$0xff] %v4644_v24  ;;  %v4647_v16 = vmul.f32 %v4590_v55, %v447_v51 }
 0x106   :  { %3256 = vmatprep.subr.mxu1 %v849_v19  ;;  %3312 = vmatprep.subr.mxu0 %v881_v61  ;;  %v4651_v19 = vmul.f32 %v4595_v56, %v4377_v35  ;;  %v4654_v61 = vmul.f32 %v467_v20, %v4396_v41  ;;  %v4671_v35 = vmul.f32 %v4585_v30, %v452_v6 }
 0x107   :  { %3257 = vmatpush3.msra.mxu1 %v833_v22  ;;  %3313 = vmatpush3.msra.mxu0 %v865_v23  ;;  %5524 = vst [vmem:[#allocation9_spill] sm:$0xff] %v4647_v16  ;;  %v4657_v22 = vmul.f32 %v4546_v45, %v452_v6  ;;  %v4661_v23 = vmul.f32 %v4568_v52, %v4396_v41 }
 0x108   :  { %3258 = vmatprep.subr.mxu1 %v848_v25  ;;  %3314 = vmatprep.subr.mxu0 %v880_v28  ;;  %5525 = vst [vmem:[#allocation10_spill] sm:$0xff] %v4651_v19  ;;  %v4664_v25 = vmul.f32 %v4573_v21, %v452_v6  ;;  %v4668_v28 = vmul.f32 %v4578_v53, %v4396_v41  ;;  %5528 = vst [vmem:[#allocation13_spill] sm:$0xff] %v4671_v35 }
 0x109   :  { %3259 = vmatpush3.msra.mxu1 %v832_v29  ;;  %3315 = vmatpush3.msra.mxu0 %v864_v32  ;;  %v4675_v20 = vmul.f32 %v4590_v55, %v4396_v41  ;;  %v4678_v29 = vmul.f32 %v4595_v56, %v452_v6  ;;  %v4680_v32 = vpop.f32.mrf.mxu1  ;;  %v4688_v51 = vadd.f32 %v4254_v62, %v317_v36 }
 0x10a   :  { %3636 = vmatprep.subr.msk.mxu1 %vm78_vm0, %v4518_v31  ;;  %3655 = vmatprep.subr.msk.mxu0 %vm78_vm0, %v4524_v33  ;;  %5526 = vst [vmem:[#allocation11_spill] sm:$0xff] %v4664_v25  ;;  %5527 = vst [vmem:[#allocation12_spill] sm:$0xff] %v4668_v28  ;;  %v4697_v28 = vld [vmem:[%s5505_s4 + $0x8] sm:$0xff] }
 0x10b   :  { %5529 = vst [vmem:[#allocation14_spill] sm:$0xff] %v4675_v20  ;;  %5530 = vst [vmem:[#allocation15_spill] sm:$0xff] %v4678_v29 }
 0x19c   :  { %v640_v37 = vpop.f32.mrf.mxu1  ;;  %v753_v14 = vpop.f32.mrf.mxu0 }
 0x19d   :  { %v800_v6 = vmul.f32 %v640_v37, %v4685_v47  ;;  %v802_v29 = vmul.f32 %v753_v14, %v4685_v47  ;;  %v482_v37 = vmul.f32 %v4546_v45, %v4688_v51 }
 0x19e   :  { %v642_v0 = vpop.f32.mrf.mxu1  ;;  %v755_v44 = vpop.f32.mrf.mxu0 }
 0x19f   :  { %v801_v41 = vmul.f32 %v642_v0, %v4685_v47  ;;  %v803_v20 = vmul.f32 %v755_v44, %v4685_v47  ;;  %v474_v44 = vmul.f32 %v4546_v45, %v4272_v4 }
 0x1a0   :  { %v646_v35 = vpop.f32.mrf.mxu1  ;;  %v759_v19 = vpop.f32.mrf.mxu0 }
 0x1a1   :  { %960 = vmatprep.mubr.f32.mxu1 %v801_v41  ;;  %1065 = vmatprep.mubr.f32.mxu0 %v803_v20  ;;  %v804_v20 = vmul.f32 %v646_v35, %v4697_v28 }
 0x1a2   :  { %v648_v36 = vpop.f32.mrf.mxu1  ;;  %v761_v16 = vpop.f32.mrf.mxu0  ;;  %961 = vmatmul.mubr.f32.vlgmr.msra.gmra.mxu1 %v800_v6  ;;  %1066 = vmatmul.mubr.f32.vlgmr.msra.gmra.mxu0 %v802_v29  ;;  %v806_v29 = vmul.f32 %v759_v19, %v4697_v28 }
 0x1a3   :  { %v805_v14 = vmul.f32 %v648_v36, %v4697_v28  ;;  %v807_v0 = vmul.f32 %v761_v16, %v4697_v28  ;;  %3637 = vmatpush3.xpose.msk.msra.mxu1 %vm78_vm0, %v4518_v31  ;;  %3656 = vmatpush3.xpose.msk.msra.mxu0 %vm78_vm0, %v4524_v33  ;;  %v473_v31 = vmul.f32 %v4568_v52, %v4482_v12 }
 0x1a4   :  { %3638 = vmatprep.subr.msk.mxu1 %vm78_vm0, %v474_v44  ;;  %3657 = vmatprep.subr.msk.mxu0 %vm78_vm0, %v482_v37  ;;  %v652_v41 = vpop.f32.mrf.mxu1  ;;  %v765_v6 = vpop.f32.mrf.mxu0  ;;  %v481_v33 = vmul.f32 %v4568_v52, %v4488_v15 }
 0x1a5   :  { %965 = vmatprep.mubr.f32.mxu1 %v805_v14  ;;  %1070 = vmatprep.mubr.f32.mxu0 %v807_v0  ;;  %v808_v14 = vmul.f32 %v652_v41, %v4685_v47  ;;  %v810_v0 = vmul.f32 %v765_v6, %v4685_v47 }
 0x1a6   :  { %v654_v36 = vpop.f32.mrf.mxu1  ;;  %v767_v16 = vpop.f32.mrf.mxu0  ;;  %966 = vmatmul.mubr.f32.gmra.mxu1 %v804_v20  ;;  %1071 = vmatmul.mubr.f32.gmra.mxu0 %v806_v29 }
 0x1a7   :  { %v809_v19 = vmul.f32 %v654_v36, %v4685_v47  ;;  %v811_v35 = vmul.f32 %v767_v16, %v4685_v47  ;;  %3639 = vmatpush3.xpose.msk.msra.mxu1 %vm78_vm0, %v474_v44  ;;  %3658 = vmatpush3.xpose.msk.msra.mxu0 %vm78_vm0, %v482_v37  ;;  %v472_v44 = vmul.f32 %v4573_v21, %v4272_v4 }
 0x1a8   :  { %3640 = vmatprep.subr.msk.mxu1 %vm78_vm0, %v473_v31  ;;  %3659 = vmatprep.subr.msk.mxu0 %vm78_vm0, %v481_v33  ;;  %v658_v20 = vpop.f32.mrf.mxu1  ;;  %v771_v29 = vpop.f32.mrf.mxu0  ;;  %v480_v37 = vmul.f32 %v4573_v21, %v4688_v51 }
 0x1a9   :  { %970 = vmatprep.mubr.f32.mxu1 %v809_v19  ;;  %1075 = vmatprep.mubr.f32.mxu0 %v811_v35  ;;  %v812_v16 = vmul.f32 %v658_v20, %v4697_v28  ;;  %v814_v19 = vmul.f32 %v771_v29, %v4697_v28 }
 0x1aa   :  { %v660_v25 = vpop.f32.mrf.mxu1  ;;  %v773_v36 = vpop.f32.mrf.mxu0  ;;  %971 = vmatmul.mubr.f32.gmra.mxu1 %v808_v14  ;;  %1076 = vmatmul.mubr.f32.gmra.mxu0 %v810_v0 }
 0x1ab   :  { %v813_v41 = vmul.f32 %v660_v25, %v4697_v28  ;;  %v815_v6 = vmul.f32 %v773_v36, %v4697_v28  ;;  %3641 = vmatpush3.xpose.msk.msra.mxu1 %vm78_vm0, %v473_v31  ;;  %3660 = vmatpush3.xpose.msk.msra.mxu0 %vm78_vm0, %v481_v33  ;;  %v471_v31 = vmul.f32 %v4578_v53, %v4482_v12 }
 0x1ac   :  { %3642 = vmatprep.subr.msk.mxu1 %vm78_vm0, %v472_v44  ;;  %3661 = vmatprep.subr.msk.mxu0 %vm78_vm0, %v480_v37  ;;  %v664_v35 = vpop.f32.mrf.mxu1  ;;  %v777_v14 = vpop.f32.mrf.mxu0  ;;  %v479_v33 = vmul.f32 %v4578_v53, %v4488_v15 }
 0x1ad   :  { %975 = vmatprep.mubr.f32.mxu1 %v813_v41  ;;  %1080 = vmatprep.mubr.f32.mxu0 %v815_v6  ;;  %v816_v36 = vmul.f32 %v664_v35, %v4685_v47  ;;  %v818_v41 = vmul.f32 %v777_v14, %v4685_v47 }
 0x1ae   :  { %v666_v0 = vpop.f32.mrf.mxu1  ;;  %v779_v25 = vpop.f32.mrf.mxu0  ;;  %976 = vmatmul.mubr.f32.gmra.mxu1 %v812_v16  ;;  %1081 = vmatmul.mubr.f32.gmra.mxu0 %v814_v19 }
 0x1af   :  { %v817_v20 = vmul.f32 %v666_v0, %v4685_v47  ;;  %v819_v29 = vmul.f32 %v779_v25, %v4685_v47  ;;  %3643 = vmatpush3.xpose.msk.msra.mxu1 %vm78_vm0, %v472_v44  ;;  %3662 = vmatpush3.xpose.msk.msra.mxu0 %vm78_vm0, %v480_v37  ;;  %v470_v44 = vmul.f32 %v4585_v30, %v4272_v4 }
 0x1b0   :  { %3644 = vmatprep.subr.msk.mxu1 %vm78_vm0, %v471_v31  ;;  %3663 = vmatprep.subr.msk.mxu0 %vm78_vm0, %v479_v33  ;;  %v670_v6 = vpop.f32.mrf.mxu1  ;;  %v783_v16 = vpop.f32.mrf.mxu0  ;;  %v478_v37 = vmul.f32 %v4585_v30, %v4688_v51 }
 0x1b1   :  { %980 = vmatprep.mubr.f32.mxu1 %v817_v20  ;;  %1085 = vmatprep.mubr.f32.mxu0 %v819_v29  ;;  %v820_v25 = vmul.f32 %v670_v6, %v4697_v28  ;;  %v822_v20 = vmul.f32 %v783_v16, %v4697_v28 }
 0x1b2   :  { %v672_v19 = vpop.f32.mrf.mxu1  ;;  %v785_v0 = vpop.f32.mrf.mxu0  ;;  %981 = vmatmul.mubr.f32.gmra.mxu1 %v816_v36  ;;  %1086 = vmatmul.mubr.f32.gmra.mxu0 %v818_v41 }
 0x1b3   :  { %v821_v35 = vmul.f32 %v672_v19, %v4697_v28  ;;  %v823_v14 = vmul.f32 %v785_v0, %v4697_v28  ;;  %3645 = vmatpush3.xpose.msk.msra.mxu1 %vm78_vm0, %v471_v31  ;;  %3664 = vmatpush3.xpose.msk.msra.mxu0 %vm78_vm0, %v479_v33  ;;  %v469_v31 = vmul.f32 %v4590_v55, %v4482_v12 }
 0x1b4   :  { %3646 = vmatprep.subr.msk.mxu1 %vm78_vm0, %v470_v44  ;;  %3665 = vmatprep.subr.msk.mxu0 %vm78_vm0, %v478_v37  ;;  %v676_v29 = vpop.f32.mrf.mxu1  ;;  %v789_v36 = vpop.f32.mrf.mxu0  ;;  %v477_v33 = vmul.f32 %v4590_v55, %v4488_v15 }
 0x1b5   :  { %985 = vmatprep.mubr.f32.mxu1 %v821_v35  ;;  %1090 = vmatprep.mubr.f32.mxu0 %v823_v14  ;;  %v824_v0 = vmul.f32 %v676_v29, %v4685_v47  ;;  %v826_v35 = vmul.f32 %v789_v36, %v4685_v47 }
 0x1b6   :  { %v678_v41 = vpop.f32.mrf.mxu1  ;;  %v791_v19 = vpop.f32.mrf.mxu0  ;;  %986 = vmatmul.mubr.f32.gmra.mxu1 %v820_v25  ;;  %1091 = vmatmul.mubr.f32.gmra.mxu0 %v822_v20 }
 0x1b7   :  { %v825_v6 = vmul.f32 %v678_v41, %v4685_v47  ;;  %v827_v16 = vmul.f32 %v791_v19, %v4685_v47  ;;  %3647 = vmatpush3.xpose.msk.msra.mxu1 %vm78_vm0, %v470_v44  ;;  %3666 = vmatpush3.xpose.msk.msra.mxu0 %vm78_vm0, %v478_v37  ;;  %v468_v44 = vmul.f32 %v4595_v56, %v4272_v4  ;;  %v1564_v19 = vld [vmem:[#allocation2 + $0x28] sm:$0xff] }
 0x1b8   :  { %3648 = vmatprep.subr.msk.mxu1 %vm78_vm0, %v469_v31  ;;  %3667 = vmatprep.subr.msk.mxu0 %vm78_vm0, %v477_v33  ;;  %v682_v12 = vpop.f32.mrf.mxu1  ;;  %v795_v14 = vpop.f32.mrf.mxu0  ;;  %v476_v37 = vmul.f32 %v4595_v56, %v4688_v51  ;;  %v328_v4 = vadd.f32 %v4254_v62, %v4541_v43  ;;  %v338_v51 = vadd.f32 %v4254_v62, %v4680_v32 }
 0x1b9   :  { %990 = vmatprep.mubr.f32.mxu1 %v825_v6  ;;  %1095 = vmatprep.mubr.f32.mxu0 %v827_v16  ;;  %v828_v29 = vmul.f32 %v682_v12, %v4697_v28  ;;  %v830_v36 = vmul.f32 %v795_v14, %v4697_v28  ;;  %v495_v43 = vmul.f32 %v4578_v53, %v4561_v49  ;;  %v1560_v6 = vld [vmem:[#allocation2 + $0x8] sm:$0xff]  ;;  %v1559_v16 = vld [vmem:[#allocation2] sm:$0xff] }
 0x1ba   :  { %v684_v15 = vpop.f32.mrf.mxu1  ;;  %v797_v25 = vpop.f32.mrf.mxu0  ;;  %991 = vmatmul.mubr.f32.gmra.mxu1 %v824_v0  ;;  %1096 = vmatmul.mubr.f32.gmra.mxu0 %v826_v35  ;;  %v490_v62 = vmul.f32 %v4546_v45, %v328_v4  ;;  %v484_v32 = vmul.f32 %v4595_v56, %v328_v4  ;;  %v492_v41 = vmul.f32 %v4595_v56, %v338_v51 }
 0x1bb   :  { %v829_v47 = vmul.f32 %v684_v15, %v4697_v28  ;;  %v831_v20 = vmul.f32 %v797_v25, %v4697_v28  ;;  %3649 = vmatpush3.xpose.msk.msra.mxu1 %vm78_vm0, %v469_v31  ;;  %3668 = vmatpush3.xpose.msk.msra.mxu0 %vm78_vm0, %v477_v33  ;;  %v493_v28 = vmul.f32 %v4590_v55, %v4561_v49  ;;  %v1563_v33 = vld [vmem:[#allocation2 + $0x20] sm:$0xff] }
 0x1bc   :  { %3650 = vmatprep.subr.msk.mxu1 %vm78_vm0, %v468_v44  ;;  %3669 = vmatprep.subr.msk.mxu0 %vm78_vm0, %v476_v37  ;;  %v505_v31 = vmul.f32 %v4568_v52, %v4532_v38 }
 0x1bd   :  { %995 = vmatprep.mubr.f32.mxu1 %v829_v47  ;;  %1100 = vmatprep.mubr.f32.mxu0 %v831_v20 }
 0x1be   :  { %996 = vmatmul.mubr.f32.gmra.mxu1 %v828_v29  ;;  %1101 = vmatmul.mubr.f32.gmra.mxu0 %v830_v36 }
 0x1bf   :  { %3651 = vmatpush3.xpose.msk.msra.mxu1 %vm78_vm0, %v468_v44  ;;  %3670 = vmatpush3.xpose.msk.msra.mxu0 %vm78_vm0, %v476_v37 }
 0x1c0   :  { %3652 = vmatprep.mubr.msk.f32.mxu1 %vm78_vm0, %v4220_v50  ;;  %3671 = vmatprep.mubr.msk.f32.mxu0 %vm78_vm0, %v4269_v3  ;;  %v498_v50 = vmul.f32 %v4546_v45, %v338_v51  ;;  %v497_v3 = vmul.f32 %v4568_v52, %v4561_v49  ;;  %v486_v45 = vmul.f32 %v4585_v30, %v328_v4  ;;  %v1565_v49 = vld [vmem:[#allocation2 + $0x30] sm:$0xff] }
 0x1c1   :  { %3674 = vmatprep.subr.msk.mxu1 %vm78_vm0, %v4558_v48  ;;  %3693 = vmatprep.subr.msk.mxu0 %vm78_vm0, %v4624_v7 }
 0x1c2   :  { %3653 = vmatmul.mubr.msk.f32.vlgmr.msra.gmra.mxu1 %vm78_vm0, %v4241_v57  ;;  %3672 = vmatmul.mubr.msk.f32.vlgmr.msra.gmra.mxu0 %vm78_vm0, %v4295_v11  ;;  %v489_v57 = vmul.f32 %v4568_v52, %v4539_v40  ;;  %v488_v11 = vmul.f32 %v4573_v21, %v328_v4  ;;  %v1561_v52 = vld [vmem:[#allocation2 + $0x10] sm:$0xff] }
 0x1c3   :  { %3675 = vmatpush3.xpose.msk.msra.mxu1 %vm78_vm0, %v4558_v48  ;;  %3694 = vmatpush3.xpose.msk.msra.mxu0 %vm78_vm0, %v4624_v7  ;;  %v494_v48 = vmul.f32 %v4585_v30, %v338_v51  ;;  %v485_v7 = vmul.f32 %v4590_v55, %v4539_v40 }
 0x1c4   :  { %3676 = vmatprep.subr.msk.mxu1 %vm78_vm0, %v490_v62  ;;  %3690 = vmatprep.mubr.msk.f32.mxu1 %vm78_vm0, %v4320_v18  ;;  %v496_v18 = vmul.f32 %v4573_v21, %v338_v51 }
 0x1c5   :  { %3695 = vmatprep.subr.msk.mxu0 %vm78_vm0, %v498_v50  ;;  %3709 = vmatprep.mubr.msk.f32.mxu0 %vm78_vm0, %v4374_v34  ;;  %v487_v34 = vmul.f32 %v4578_v53, %v4539_v40  ;;  %v1566_v40 = vld [vmem:[#allocation2 + $0x38] sm:$0xff] }
 0x1c7   :  { %3677 = vmatpush3.xpose.msk.msra.mxu1 %vm78_vm0, %v490_v62  ;;  %3696 = vmatpush3.xpose.msk.msra.mxu0 %vm78_vm0, %v498_v50 }
 0x1c8   :  { %3678 = vmatprep.subr.msk.mxu1 %vm78_vm0, %v489_v57  ;;  %3697 = vmatprep.subr.msk.mxu0 %vm78_vm0, %v497_v3 }
 0x1cb   :  { %3679 = vmatpush3.xpose.msk.msra.mxu1 %vm78_vm0, %v489_v57  ;;  %3698 = vmatpush3.xpose.msk.msra.mxu0 %vm78_vm0, %v497_v3 }
 0x1cc   :  { %3680 = vmatprep.subr.msk.mxu1 %vm78_vm0, %v488_v11  ;;  %3699 = vmatprep.subr.msk.mxu0 %vm78_vm0, %v496_v18 }
 0x1cf   :  { %3681 = vmatpush3.xpose.msk.msra.mxu1 %vm78_vm0, %v488_v11  ;;  %3700 = vmatpush3.xpose.msk.msra.mxu0 %vm78_vm0, %v496_v18 }
 0x1d0   :  { %3682 = vmatprep.subr.msk.mxu1 %vm78_vm0, %v487_v34  ;;  %3701 = vmatprep.subr.msk.mxu0 %vm78_vm0, %v495_v43 }
 0x1d3   :  { %3683 = vmatpush3.xpose.msk.msra.mxu1 %vm78_vm0, %v487_v34  ;;  %3702 = vmatpush3.xpose.msk.msra.mxu0 %vm78_vm0, %v495_v43 }
 0x1d4   :  { %3684 = vmatprep.subr.msk.mxu1 %vm78_vm0, %v486_v45  ;;  %3703 = vmatprep.subr.msk.mxu0 %vm78_vm0, %v494_v48 }
 0x1d7   :  { %3685 = vmatpush3.xpose.msk.msra.mxu1 %vm78_vm0, %v486_v45  ;;  %3704 = vmatpush3.xpose.msk.msra.mxu0 %vm78_vm0, %v494_v48 }
 0x1d8   :  { %3686 = vmatprep.subr.msk.mxu1 %vm78_vm0, %v485_v7  ;;  %3705 = vmatprep.subr.msk.mxu0 %vm78_vm0, %v493_v28 }
 0x1db   :  { %3687 = vmatpush3.xpose.msk.msra.mxu1 %vm78_vm0, %v485_v7  ;;  %3706 = vmatpush3.xpose.msk.msra.mxu0 %vm78_vm0, %v493_v28 }
 0x1dc   :  { %3688 = vmatprep.subr.msk.mxu1 %vm78_vm0, %v484_v32  ;;  %3707 = vmatprep.subr.msk.mxu0 %vm78_vm0, %v492_v41 }
 0x1df   :  { %3689 = vmatpush3.xpose.msk.msra.mxu1 %vm78_vm0, %v484_v32  ;;  %3708 = vmatpush3.xpose.msk.msra.mxu0 %vm78_vm0, %v492_v41 }
 0x1e0   :  { %3740 = vmatprep.subr.mxu0 %v4549_v46  ;;  %3712 = vmatprep.subr.mxu1 %v1566_v40 }
 0x1e2   :  { %3691 = vmatmul.mubr.msk.f32.vlgmr.msra.gmra.mxu1 %vm78_vm0, %v4348_v26  ;;  %3710 = vmatmul.mubr.msk.f32.vlgmr.msra.gmra.mxu0 %vm78_vm0, %v4402_v42  ;;  %v504_v26 = vmul.f32 %v4573_v21, %v4536_v39  ;;  %v1562_v42 = vld [vmem:[#allocation2 + $0x18] sm:$0xff]  ;;  %v501_v21 = vmul.f32 %v4590_v55, %v4532_v38 }
 0x1e3   :  { %3713 = vmatpush3.msra.mxu1 %v1566_v40  ;;  %3741 = vmatpush3.msra.mxu0 %v4549_v46  ;;  %v503_v46 = vmul.f32 %v4578_v53, %v4532_v38  ;;  %v500_v53 = vmul.f32 %v4595_v56, %v4536_v39 }
 0x1e4   :  { %3714 = vmatprep.subr.mxu1 %v1565_v49  ;;  %3742 = vmatprep.subr.mxu0 %v4555_v17 }
 0x1e5   :  { %3715 = vmatpush3.msra.mxu1 %v1565_v49  ;;  %3743 = vmatpush3.msra.mxu0 %v4555_v17  ;;  %v502_v17 = vmul.f32 %v4585_v30, %v4536_v39 }
 0x1e6   :  { %3716 = vmatprep.subr.mxu1 %v1564_v19  ;;  %3744 = vmatprep.subr.mxu0 %v505_v31 }
 0x1e7   :  { %3717 = vmatpush3.msra.mxu1 %v1564_v19  ;;  %3745 = vmatpush3.msra.mxu0 %v505_v31 }
 0x1e8   :  { %3718 = vmatprep.subr.mxu1 %v1563_v33  ;;  %3746 = vmatprep.subr.mxu0 %v504_v26 }
 0x1e9   :  { %3719 = vmatpush3.msra.mxu1 %v1563_v33  ;;  %3747 = vmatpush3.msra.mxu0 %v504_v26 }
 0x1ea   :  { %3720 = vmatprep.subr.mxu1 %v1562_v42  ;;  %3748 = vmatprep.subr.mxu0 %v503_v46 }
 0x1eb   :  { %3721 = vmatpush3.msra.mxu1 %v1562_v42  ;;  %3749 = vmatpush3.msra.mxu0 %v503_v46 }
 0x1ec   :  { %3722 = vmatprep.subr.mxu1 %v1561_v52  ;;  %3750 = vmatprep.subr.mxu0 %v502_v17 }
 0x1ed   :  { %3723 = vmatpush3.msra.mxu1 %v1561_v52  ;;  %3751 = vmatpush3.msra.mxu0 %v502_v17 }
 0x1ee   :  { %3724 = vmatprep.subr.mxu1 %v1560_v6  ;;  %3752 = vmatprep.subr.mxu0 %v501_v21 }
 0x1ef   :  { %3725 = vmatpush3.msra.mxu1 %v1560_v6  ;;  %3753 = vmatpush3.msra.mxu0 %v501_v21 }
 0x1f0   :  { %3726 = vmatprep.subr.mxu1 %v1559_v16  ;;  %3754 = vmatprep.subr.mxu0 %v500_v53 }
 0x1f1   :  { %3727 = vmatpush3.msra.mxu1 %v1559_v16  ;;  %3755 = vmatpush3.msra.mxu0 %v500_v53 }
 0x1f2   :  { %3759 = vmatprep.subr.mxu1 %v4580_v54  ;;  %3778 = vmatprep.subr.mxu0 %v4626_v8 }
 0x262   :  { %v3260_v30 = vpop.f32.mrf.mxu1  ;;  %v3316_v38 = vpop.f32.mrf.mxu0 }
 0x264   :  { %v3261_v55 = vpop.f32.mrf.mxu1  ;;  %v3317_v0 = vpop.f32.mrf.mxu0 }
 0x265   :  { %v3262_v48 = vadd.f32 %v3261_v55, %v3260_v30  ;;  %v3318_v7 = vadd.f32 %v3317_v0, %v3316_v38 }
 0x266   :  { %v3263_v35 = vpop.f32.mrf.mxu1  ;;  %v3319_v12 = vpop.f32.mrf.mxu0 }
 0x267   :  { %v1068_v21 = vadd.f32 %v3318_v7, %v3262_v48 }
 0x268   :  { %v3264_v14 = vpop.f32.mrf.mxu1  ;;  %v3320_v15 = vpop.f32.mrf.mxu0 }
 0x269   :  { %v3265_v28 = vadd.f32 %v3264_v14, %v3263_v35  ;;  %v3321_v32 = vadd.f32 %v3320_v15, %v3319_v12 }
 0x26a   :  { %v3266_v25 = vpop.f32.mrf.mxu1  ;;  %v3322_v39 = vpop.f32.mrf.mxu0 }
 0x26b   :  { %v1073_v17 = vadd.f32 %v3321_v32, %v3265_v28 }
 0x26c   :  { %v3267_v56 = vpop.f32.mrf.mxu1  ;;  %v3323_v44 = vpop.f32.mrf.mxu0 }
 0x26d   :  { %v3268_v49 = vadd.f32 %v3267_v56, %v3266_v25  ;;  %v3324_v19 = vadd.f32 %v3323_v44, %v3322_v39 }
 0x26e   :  { %v3269_v37 = vpop.f32.mrf.mxu1  ;;  %v3325_v47 = vpop.f32.mrf.mxu0 }
 0x26f   :  { %v1078_v16 = vadd.f32 %v3324_v19, %v3268_v49 }
 0x270   :  { %v3270_v20 = vpop.f32.mrf.mxu1  ;;  %v3326_v29 = vpop.f32.mrf.mxu0 }
 0x271   :  { %v3271_v31 = vadd.f32 %v3270_v20, %v3269_v37  ;;  %v3327_v33 = vadd.f32 %v3326_v29, %v3325_v47 }
 0x272   :  { %v3272_v36 = vpop.f32.mrf.mxu1  ;;  %v3328_v4 = vpop.f32.mrf.mxu0 }
 0x273   :  { %v1083_v6 = vadd.f32 %v3327_v33, %v3271_v31 }
 0x274   :  { %v3273_v51 = vpop.f32.mrf.mxu1  ;;  %v3329_v62 = vpop.f32.mrf.mxu0 }
 0x275   :  { %v3274_v29 = vadd.f32 %v3273_v51, %v3272_v36  ;;  %v3330_v48 = vadd.f32 %v3329_v62, %v3328_v4 }
 0x276   :  { %v3275_v50 = vpop.f32.mrf.mxu1  ;;  %v3331_v57 = vpop.f32.mrf.mxu0 }
 0x278   :  { %v3276_v3 = vpop.f32.mrf.mxu1  ;;  %v3332_v11 = vpop.f32.mrf.mxu0 }
 0x279   :  { %v3277_v37 = vadd.f32 %v3276_v3, %v3275_v50  ;;  %v3333_v47 = vadd.f32 %v3332_v11, %v3331_v57 }
 0x27a   :  { %v3278_v18 = vpop.f32.mrf.mxu1  ;;  %v3334_v34 = vpop.f32.mrf.mxu0 }
 0x27b   :  { %v1093_v32 = vadd.f32 %v3333_v47, %v3277_v37 }
 0x27c   :  { %v3279_v43 = vpop.f32.mrf.mxu1  ;;  %v3335_v45 = vpop.f32.mrf.mxu0 }
 0x27d   :  { %v3280_v7 = vadd.f32 %v3279_v43, %v3278_v18  ;;  %v3336_v28 = vadd.f32 %v3335_v45, %v3334_v34 }
 0x27e   :  { %v3281_v41 = vpop.f32.mrf.mxu1  ;;  %v3337_v40 = vpop.f32.mrf.mxu0 }
 0x280   :  { %v3282_v26 = vpop.f32.mrf.mxu1  ;;  %v3338_v42 = vpop.f32.mrf.mxu0 }
 0x281   :  { %v3339_v20 = vadd.f32 %v3338_v42, %v3337_v40 }
 0x282   :  { %v3654_v46 = vpop.f32.mrf.mxu1  ;;  %v3673_v52 = vpop.f32.mrf.mxu0 }
 0x283   :  { %v1202_v30 = vadd.f32 %v3654_v46, %v1073_v17  ;;  %v1301_v38 = vadd.f32 %v3673_v52, %v1083_v6  ;;  %v1088_v52 = vadd.f32 %v3330_v48, %v3274_v29  ;;  %v1098_v17 = vadd.f32 %v3336_v28, %v3280_v7 }
 0x284   :  { %v1196_v53 = vpop.f32.mrf.mxu1  ;;  %v1295_v24 = vpop.f32.mrf.mxu0 }
 0x285   :  { %v1197_v55 = vadd.f32 %v1196_v53, %v1068_v21  ;;  %v1296_v0 = vadd.f32 %v1295_v24, %v1078_v16  ;;  %v1503_v14 = vmul.f32 0.35355338, %v1202_v30  ;;  %v1505_v15 = vmul.f32 0.35355338, %v1301_v38 }
 0x286   :  { %v3283_v24 = vadd.f32 %v3282_v26, %v3281_v41 }
 0x287   :  { %v1502_v35 = vmul.f32 0.35355338, %v1197_v55  ;;  %v1504_v12 = vmul.f32 0.35355338, %v1296_v0  ;;  %v1520_v56 = vsel %vm1510_vm1, %v1505_v15, -inf  ;;  %v1514_v44 = vsel %vm1510_vm1, %v1503_v14, -inf }
 0x288   :  { %v1103_v49 = vadd.f32 %v3339_v20, %v3283_v24 }
 0x289   :  { %v1517_v25 = vsel %vm1510_vm1, %v1504_v12, -inf  ;;  %v1511_v39 = vsel %vm1510_vm1, %v1502_v35, -inf }
 0x28a   :  { %1518 = vmax.xlane.f32.xlu1 %v1517_v25  ;;  %1512 = vmax.xlane.f32.xlu0 %v1511_v39 }
 0x28e   :  { %1521 = vmax.xlane.f32.xlu1 %v1520_v56  ;;  %1515 = vmax.xlane.f32.xlu0 %v1514_v44 }
 0x2a2   :  { %v3692_v19 = vpop.f32.mrf.mxu1  ;;  %v3711_v31 = vpop.f32.mrf.mxu0 }
 0x2a3   :  { %v1400_v33 = vadd.f32 %v3692_v19, %v1093_v32  ;;  %v1499_v46 = vadd.f32 %v3711_v31, %v1103_v49 }
 0x2a4   :  { %v1394_v6 = vpop.f32.mrf.mxu1  ;;  %v1493_v21 = vpop.f32.mrf.mxu0 }
 0x2a5   :  { %v1507_v16 = vmul.f32 0.35355338, %v1400_v33  ;;  %v1395_v53 = vadd.f32 %v1394_v6, %v1088_v52  ;;  %v1494_v50 = vadd.f32 %v1493_v21, %v1098_v17  ;;  %v1509_v57 = vmul.f32 0.35355338, %v1499_v46  ;;  %v5536_v21 = vld [vmem:[#allocation13_spill] sm:$0xff] }
 0x2a7   :  { %v1506_v3 = vmul.f32 0.35355338, %v1395_v53  ;;  %v1526_v36 = vsel %vm1510_vm1, %v1507_v16, -inf  ;;  %v1508_v4 = vmul.f32 0.35355338, %v1494_v50  ;;  %v1532_v62 = vsel %vm1510_vm1, %v1509_v57, -inf }
 0x2a8   :  { %1527 = vmax.xlane.f32.xlu1 %v1526_v36  ;;  %v5537_v53 = vld [vmem:[#allocation14_spill] sm:$0xff]  ;;  %v2067_v50 = vld [vmem:[%s5509_s8 + $0xf8] sm:$0xff] }
 0x2a9   :  { %v1523_v51 = vsel %vm1510_vm1, %v1506_v3, -inf  ;;  %v1529_v11 = vsel %vm1510_vm1, %v1508_v4, -inf }
 0x2aa   :  { %1524 = vmax.xlane.f32.xlu0 %v1523_v51 }
 0x2ac   :  { %1533 = vmax.xlane.f32.xlu1 %v1532_v62  ;;  %v2064_v62 = vld [vmem:[%s5509_s8 + $0xe0] sm:$0xff] }
 0x2ae   :  { %1530 = vmax.xlane.f32.xlu0 %v1529_v11 }
 0x313   :  { %v1519_v18 = vpop.xlane.xlu1 %1518  ;;  %v1513_v34 = vpop.xlane.xlu0 %1512 }
 0x314   :  { %v1535_v43 = vsub.f32 %v1502_v35, %v1513_v34  ;;  %v1537_v45 = vsub.f32 %v1504_v12, %v1519_v18  ;;  %v2061_v18 = vld [vmem:[%s5509_s8 + $0xc8] sm:$0xff] }
 0x316   :  { %v1543_v41 = vmul.f32 1.442695, %v1535_v43  ;;  %v1547_v38 = vmul.f32 1.442695, %v1537_v45  ;;  %v2060_v43 = vld [vmem:[%s5509_s8 + $0xc0] sm:$0xff] }
 0x317   :  { %v1522_v40 = vpop.xlane.xlu1 %1521  ;;  %v1516_v26 = vpop.xlane.xlu0 %1515 }
 0x318   :  { %v1536_v42 = vsub.f32 %v1503_v14, %v1516_v26  ;;  %3869 = vpow2.f32 %v1543_v41  ;;  %v1538_v30 = vsub.f32 %v1505_v15, %v1522_v40  ;;  %v2057_v41 = vld [vmem:[%s5509_s8 + $0xa8] sm:$0xff]  ;;  %v5539_v40 = vmov 0.0  }
 0x31a   :  { %v1545_v55 = vmul.f32 1.442695, %v1536_v42  ;;  %v1549_v0 = vmul.f32 1.442695, %v1538_v30  ;;  %v2056_v42 = vld [vmem:[%s5509_s8 + $0xa0] sm:$0xff]  ;;  %v2066_v30 = vld [vmem:[%s5509_s8 + $0xf0] sm:$0xff] }
 0x31c   :  { %3871 = vpow2.f32 %v1545_v55  ;;  %v2063_v55 = vld [vmem:[%s5509_s8 + $0xd8] sm:$0xff] }
 0x31d   :  { %3873 = vpow2.f32 %v1547_v38  ;;  %v2053_v38 = vld [vmem:[%s5509_s8 + $0x88] sm:$0xff] }
 0x31e   :  { %3875 = vpow2.f32 %v1549_v0  ;;  %v2052_v0 = vld [vmem:[%s5509_s8 + $0x80] sm:$0xff] }
 0x325   :  { %v3870_v25 = vpop.eup %3869 }
 0x326   :  { %3728 = vmatprep.mubr.msk.f32.mxu1 %vm1510_vm1, %v3870_v25 }
 0x329   :  { %v3872_v39 = vpop.eup %3871 }
 0x32a   :  { %v3874_v56 = vpop.eup %3873  ;;  %3729 = vmatmul.mubr.msk.f32.vlgmr.msra.gmra.mxu1 %vm1510_vm1, %v3872_v39 }
 0x32b   :  { %3760 = vmatpush3.msra.mxu1 %v4580_v54  ;;  %3731 = vmatprep.mubr.msk.f32.mxu1 %vm1510_vm1, %v3874_v56  ;;  %v3876_v35 = vpop.eup %3875 }
 0x32c   :  { %3761 = vmatprep.subr.mxu1 %v4599_v58 }
 0x32d   :  { %3762 = vmatpush3.msra.mxu1 %v4599_v58 }
 0x32e   :  { %3763 = vmatprep.subr.mxu1 %v4602_v59  ;;  %3732 = vmatmul.mubr.msk.f32.gmra.mxu1 %vm1510_vm1, %v3876_v35 }
 0x32f   :  { %3764 = vmatpush3.msra.mxu1 %v4602_v59 }
 0x330   :  { %3765 = vmatprep.subr.mxu1 %v4606_v60 }
 0x331   :  { %v1528_v12 = vpop.xlane.xlu1 %1527  ;;  %3766 = vmatpush3.msra.mxu1 %v4606_v60 }
 0x332   :  { %v1540_v14 = vsub.f32 %v1507_v16, %v1528_v12  ;;  %3767 = vmatprep.subr.mxu1 %v4609_v63  ;;  %v2058_v12 = vld [vmem:[%s5509_s8 + $0xb0] sm:$0xff] }
 0x333   :  { %v1525_v54 = vpop.xlane.xlu0 %1524  ;;  %3768 = vmatpush3.msra.mxu1 %v4609_v63 }
 0x334   :  { %v1539_v15 = vsub.f32 %v1506_v3, %v1525_v54  ;;  %v1553_v44 = vmul.f32 1.442695, %v1540_v14  ;;  %3769 = vmatprep.subr.mxu1 %v4613_v1  ;;  %v2045_v14 = vld [vmem:[%s5509_s8 + $0x48] sm:$0xff]  ;;  %v2055_v54 = vld [vmem:[%s5509_s8 + $0x98] sm:$0xff] }
 0x335   :  { %v1534_v58 = vpop.xlane.xlu1 %1533  ;;  %3770 = vmatpush3.msra.mxu1 %v4613_v1 }
 0x336   :  { %v1551_v37 = vmul.f32 1.442695, %v1539_v15  ;;  %v1542_v59 = vsub.f32 %v1509_v57, %v1534_v58  ;;  %3771 = vmatprep.subr.mxu1 %v4616_v2  ;;  %v5538_v57 = vld [vmem:[#allocation15_spill] sm:$0xff]  ;;  %v2044_v15 = vld [vmem:[%s5509_s8 + $0x40] sm:$0xff]  ;;  %v2041_v58 = vld [vmem:[%s5509_s8 + $0x28] sm:$0xff] }
 0x337   :  { %v1531_v47 = vpop.xlane.xlu0 %1530  ;;  %3772 = vmatpush3.msra.mxu1 %v4616_v2 }
 0x338   :  { %3877 = vpow2.f32 %v1551_v37  ;;  %v1541_v60 = vsub.f32 %v1508_v4, %v1531_v47  ;;  %v1557_v24 = vmul.f32 1.442695, %v1542_v59  ;;  %3773 = vmatprep.subr.mxu1 %v4620_v5  ;;  %v2051_v37 = vld [vmem:[%s5509_s8 + $0x78] sm:$0xff]  ;;  %v2040_v59 = vld [vmem:[%s5509_s8 + $0x20] sm:$0xff]  ;;  %v2050_v47 = vld [vmem:[%s5509_s8 + $0x70] sm:$0xff] }
 0x339   :  { %3879 = vpow2.f32 %v1553_v44  ;;  %3774 = vmatpush3.msra.mxu1 %v4620_v5  ;;  %v2054_v44 = vld [vmem:[%s5509_s8 + $0x90] sm:$0xff] }
 0x33a   :  { %v1555_v63 = vmul.f32 1.442695, %v1541_v60  ;;  %3797 = vmatprep.subr.mxu1 %v4654_v61  ;;  %v2037_v60 = vld [vmem:[%s5509_s8 + $0x8] sm:$0xff] }
 0x33c   :  { %3881 = vpow2.f32 %v1555_v63  ;;  %v2036_v63 = vld [vmem:[%s5509_s8] sm:$0xff] }
 0x33d   :  { %3883 = vpow2.f32 %v1557_v24  ;;  %v2047_v24 = vld [vmem:[%s5509_s8 + $0x58] sm:$0xff] }
 0x345   :  { %v4909_v1 = vpop.eup %3877 }
 0x346   :  { %v4911_v20 = vpop.eup %3879  ;;  %3734 = vmatprep.mubr.msk.f32.mxu1 %vm1510_vm1, %v4909_v1 }
 0x347   :  { %3735 = vmatmul.mubr.msk.f32.gmra.mxu1 %vm1510_vm1, %v4911_v20 }
 0x349   :  { %v4917_v2 = vpop.eup %3881 }
 0x34a   :  { %v4919_v29 = vpop.eup %3883  ;;  %3737 = vmatprep.mubr.msk.f32.mxu1 %vm1510_vm1, %v4917_v2 }
 0x34b   :  { %3738 = vmatmul.mubr.msk.f32.gmra.mxu1 %vm1510_vm1, %v4919_v29 }
 0x3ea   :  { %v3730_v5 = vpop.f32.mrf.mxu1 }
 0x3eb   :  { %3885 = vrcp.f32 %v3730_v5  ;;  %v2038_v5 = vld [vmem:[%s5509_s8 + $0x10] sm:$0xff] }
 0x3ec   :  { %v1657_v48 = vpop.f32.mrf.mxu1 }
 0x3ed   :  { %3887 = vrcp.f32 %v1657_v48  ;;  %v2357_v48 = vld [vmem:[%s5510_s9 + $0xf8] sm:$0xff] }
 0x3ee   :  { %v3733_v7 = vpop.f32.mrf.mxu1 }
 0x3ef   :  { %3889 = vrcp.f32 %v3733_v7  ;;  %v2341_v7 = vld [vmem:[%s5510_s9 + $0x78] sm:$0xff] }
 0x3f0   :  { %v1667_v28 = vpop.f32.mrf.mxu1 }
 0x3f1   :  { %3891 = vrcp.f32 %v1667_v28  ;;  %v2356_v28 = vld [vmem:[%s5510_s9 + $0xf0] sm:$0xff] }
 0x3f8   :  { %v3886_v32 = vpop.eup %3885 }
 0x3f9   :  { %v4927_v31 = vmul.f32 %v3886_v32, %v3872_v39  ;;  %v2049_v39 = vld [vmem:[%s5509_s8 + $0x68] sm:$0xff]  ;;  %v2389_v32 = vld [vmem:[%s5510_s9 + $0x1f8] sm:$0xff] }
 0x3fa   :  { %v3888_v49 = vpop.eup %3887 }
 0x3fb   :  { %v4925_v19 = vmul.f32 %v3888_v49, %v3870_v25  ;;  %v2062_v25 = vld [vmem:[%s5509_s8 + $0xd0] sm:$0xff] }
 0x3fc   :  { %v3890_v33 = vpop.eup %3889  ;;  %v2340_v49 = vld [vmem:[%s5510_s9 + $0x70] sm:$0xff] }
 0x3fd   :  { %3756 = vmatprep.mubr.msk.f32.mxu0 %vm1510_vm1, %v4925_v19  ;;  %v4936_v17 = vmul.f32 %v3890_v33, %v3876_v35  ;;  %v2048_v35 = vld [vmem:[%s5509_s8 + $0x60] sm:$0xff]  ;;  %v2339_v33 = vld [vmem:[%s5510_s9 + $0x68] sm:$0xff] }
 0x3fe   :  { %v3892_v46 = vpop.eup %3891  ;;  %3757 = vmatmul.mubr.msk.f32.vlgmr.msra.gmra.mxu0 %vm1510_vm1, %v4927_v31 }
 0x3ff   :  { %3779 = vmatpush3.msra.mxu0 %v4626_v8  ;;  %v4934_v52 = vmul.f32 %v3892_v46, %v3874_v56  ;;  %v2059_v56 = vld [vmem:[%s5509_s8 + $0xb8] sm:$0xff]  ;;  %v2388_v46 = vld [vmem:[%s5510_s9 + $0x1f0] sm:$0xff] }
 0x400   :  { %3780 = vmatprep.subr.mxu0 %v4630_v9 }
 0x401   :  { %3781 = vmatpush3.msra.mxu0 %v4630_v9  ;;  %3775 = vmatprep.mubr.msk.f32.mxu1 %vm1510_vm1, %v4934_v52  ;;  %v5531_v9 = vld [vmem:[#allocation8_spill] sm:$0xff] }
 0x402   :  { %3782 = vmatprep.subr.mxu0 %v4633_v10  ;;  %3776 = vmatmul.mubr.msk.f32.vlgmr.msra.gmra.mxu1 %vm1510_vm1, %v4936_v17 }
 0x403   :  { %3783 = vmatpush3.msra.mxu0 %v4633_v10  ;;  %3798 = vmatpush3.msra.mxu1 %v4654_v61  ;;  %v5532_v10 = vld [vmem:[#allocation11_spill] sm:$0xff] }
 0x404   :  { %3784 = vmatprep.subr.mxu0 %v4637_v13  ;;  %3799 = vmatprep.subr.mxu1 %v4657_v22 }
 0x405   :  { %3785 = vmatpush3.msra.mxu0 %v4637_v13  ;;  %3800 = vmatpush3.msra.mxu1 %v4657_v22  ;;  %v5533_v13 = vld [vmem:[#allocation9_spill] sm:$0xff]  ;;  %v5534_v22 = vld [vmem:[#allocation12_spill] sm:$0xff] }
 0x406   :  { %3786 = vmatprep.subr.mxu0 %v4640_v27  ;;  %3801 = vmatprep.subr.mxu1 %v4661_v23 }
 0x407   :  { %v3736_v8 = vpop.f32.mrf.mxu1  ;;  %3787 = vmatpush3.msra.mxu0 %v4640_v27  ;;  %3802 = vmatpush3.msra.mxu1 %v4661_v23  ;;  %v2065_v27 = vld [vmem:[%s5509_s8 + $0xe8] sm:$0xff]  ;;  %v5535_v23 = vld [vmem:[#allocation10_spill] sm:$0xff] }
 0x408   :  { %3893 = vrcp.f32 %v3736_v8  ;;  %3788 = vmatprep.subr.mxu0 %v5531_v9  ;;  %3803 = vmatprep.subr.mxu1 %v5532_v10  ;;  %v2338_v8 = vld [vmem:[%s5510_s9 + $0x60] sm:$0xff] }
 0x409   :  { %v1677_v61 = vpop.f32.mrf.mxu1  ;;  %3789 = vmatpush3.msra.mxu0 %v5531_v9  ;;  %3804 = vmatpush3.msra.mxu1 %v5532_v10  ;;  %v2387_v9 = vld [vmem:[%s5510_s9 + $0x1e8] sm:$0xff]  ;;  %v2353_v10 = vld [vmem:[%s5510_s9 + $0xd8] sm:$0xff] }
 0x40a   :  { %3895 = vrcp.f32 %v1677_v61  ;;  %3790 = vmatprep.subr.mxu0 %v5533_v13  ;;  %3805 = vmatprep.subr.mxu1 %v5534_v22  ;;  %v2371_v61 = vld [vmem:[%s5510_s9 + $0x168] sm:$0xff] }
 0x40b   :  { %v3739_v6 = vpop.f32.mrf.mxu1  ;;  %3791 = vmatpush3.msra.mxu0 %v5533_v13  ;;  %3806 = vmatpush3.msra.mxu1 %v5534_v22  ;;  %v2337_v13 = vld [vmem:[%s5510_s9 + $0x58] sm:$0xff]  ;;  %v2386_v22 = vld [vmem:[%s5510_s9 + $0x1e0] sm:$0xff] }
 0x40c   :  { %3897 = vrcp.f32 %v3739_v6  ;;  %3792 = vmatprep.subr.mxu0 %v5535_v23  ;;  %3807 = vmatprep.subr.mxu1 %v5536_v21  ;;  %v2352_v6 = vld [vmem:[%s5510_s9 + $0xd0] sm:$0xff] }
 0x40d   :  { %v1687_v16 = vpop.f32.mrf.mxu1  ;;  %3793 = vmatpush3.msra.mxu0 %v5535_v23  ;;  %3808 = vmatpush3.msra.mxu1 %v5536_v21  ;;  %v2336_v23 = vld [vmem:[%s5510_s9 + $0x50] sm:$0xff]  ;;  %v2385_v21 = vld [vmem:[%s5510_s9 + $0x1d8] sm:$0xff] }
 0x40e   :  { %3899 = vrcp.f32 %v1687_v16  ;;  %3809 = vmatprep.subr.mxu1 %v5537_v53  ;;  %2084 = vmatprep.subr.mxu0 %v2065_v27  ;;  %v2370_v27 = vld [vmem:[%s5510_s9 + $0x160] sm:$0xff]  ;;  %v2351_v16 = vld [vmem:[%s5510_s9 + $0xc8] sm:$0xff] }
 0x40f   :  { %3810 = vmatpush3.msra.mxu1 %v5537_v53  ;;  %v2369_v53 = vld [vmem:[%s5510_s9 + $0x158] sm:$0xff] }
 0x410   :  { %3811 = vmatprep.subr.mxu1 %v5538_v57 }
 0x411   :  { %3812 = vmatpush3.msra.mxu1 %v5538_v57  ;;  %v2384_v57 = vld [vmem:[%s5510_s9 + $0x1d0] sm:$0xff] }
 0x412   :  { %2197 = vmatprep.subr.mxu1 %v2067_v50  ;;  %v2335_v50 = vld [vmem:[%s5510_s9 + $0x48] sm:$0xff] }
 0x415   :  { %v3894_v3 = vpop.eup %3893 }
 0x416   :  { %v4981_v51 = vmul.f32 %v3894_v3, %v4911_v20  ;;  %v2043_v20 = vld [vmem:[%s5509_s8 + $0x38] sm:$0xff]  ;;  %v2350_v3 = vld [vmem:[%s5510_s9 + $0xc0] sm:$0xff] }
 0x417   :  { %v3896_v36 = vpop.eup %3895 }
 0x418   :  { %v4978_v4 = vmul.f32 %v3896_v36, %v4909_v1  ;;  %v2046_v1 = vld [vmem:[%s5509_s8 + $0x50] sm:$0xff] }
 0x419   :  { %v3898_v11 = vpop.eup %3897  ;;  %v2368_v36 = vld [vmem:[%s5510_s9 + $0x150] sm:$0xff] }
 0x41a   :  { %3794 = vmatprep.mubr.msk.f32.mxu0 %vm1510_vm1, %v4978_v4  ;;  %v5004_v26 = vmul.f32 %v3898_v11, %v4919_v29  ;;  %v2039_v29 = vld [vmem:[%s5509_s8 + $0x18] sm:$0xff]  ;;  %v2367_v11 = vld [vmem:[%s5510_s9 + $0x148] sm:$0xff] }
 0x41b   :  { %v3900_v34 = vpop.eup %3899  ;;  %3795 = vmatmul.mubr.msk.f32.vlgmr.msra.gmra.mxu0 %vm1510_vm1, %v4981_v51 }
 0x41c   :  { %2085 = vmatpush1.msra.mxu0 %v2064_v62  ;;  %v4997_v45 = vmul.f32 %v3900_v34, %v4917_v2  ;;  %2132 = vmatprep.mubr.f32.mxu0 %v5539_v40  ;;  %v2042_v2 = vld [vmem:[%s5509_s8 + $0x30] sm:$0xff]  ;;  %v2349_v62 = vld [vmem:[%s5510_s9 + $0xb8] sm:$0xff]  ;;  %v2382_v34 = vld [vmem:[%s5510_s9 + $0x1c0] sm:$0xff] }
 0x41d   :  { %2086 = vmatprep.subr.mxu0 %v2061_v18  ;;  %v2333_v18 = vld [vmem:[%s5510_s9 + $0x38] sm:$0xff] }
 0x41e   :  { %2087 = vmatpush1.msra.mxu0 %v2060_v43  ;;  %3813 = vmatprep.mubr.msk.f32.mxu1 %vm1510_vm1, %v4997_v45  ;;  %v2348_v43 = vld [vmem:[%s5510_s9 + $0xb0] sm:$0xff] }
 0x41f   :  { %2088 = vmatprep.subr.mxu0 %v2057_v41  ;;  %3814 = vmatmul.mubr.msk.f32.vlgmr.msra.gmra.mxu1 %vm1510_vm1, %v5004_v26  ;;  %v2332_v41 = vld [vmem:[%s5510_s9 + $0x30] sm:$0xff] }
 0x420   :  { %2089 = vmatpush1.msra.mxu0 %v2056_v42  ;;  %2198 = vmatpush1.msra.mxu1 %v2066_v30  ;;  %v2365_v42 = vld [vmem:[%s5510_s9 + $0x138] sm:$0xff]  ;;  %v2331_v30 = vld [vmem:[%s5510_s9 + $0x28] sm:$0xff] }
 0x421   :  { %2090 = vmatprep.subr.mxu0 %v2053_v38  ;;  %2199 = vmatprep.subr.mxu1 %v2063_v55  ;;  %v2380_v38 = vld [vmem:[%s5510_s9 + $0x1b0] sm:$0xff]  ;;  %v2346_v55 = vld [vmem:[%s5510_s9 + $0xa0] sm:$0xff] }
 0x422   :  { %2091 = vmatpush1.msra.mxu0 %v2052_v0  ;;  %2200 = vmatpush1.msra.mxu1 %v2062_v25  ;;  %v2364_v0 = vld [vmem:[%s5510_s9 + $0x130] sm:$0xff]  ;;  %v2330_v25 = vld [vmem:[%s5510_s9 + $0x20] sm:$0xff] }
 0x423   :  { %2092 = vmatprep.subr.mxu0 %v2049_v39  ;;  %2201 = vmatprep.subr.mxu1 %v2059_v56  ;;  %v2379_v39 = vld [vmem:[%s5510_s9 + $0x1a8] sm:$0xff]  ;;  %v2345_v56 = vld [vmem:[%s5510_s9 + $0x98] sm:$0xff] }
 0x424   :  { %2093 = vmatpush1.msra.mxu0 %v2048_v35  ;;  %2202 = vmatpush1.msra.mxu1 %v2058_v12  ;;  %v2363_v35 = vld [vmem:[%s5510_s9 + $0x128] sm:$0xff]  ;;  %v2329_v12 = vld [vmem:[%s5510_s9 + $0x18] sm:$0xff] }
 0x425   :  { %2094 = vmatprep.subr.mxu0 %v2045_v14  ;;  %2203 = vmatprep.subr.mxu1 %v2055_v54  ;;  %v2378_v14 = vld [vmem:[%s5510_s9 + $0x1a0] sm:$0xff]  ;;  %v2344_v54 = vld [vmem:[%s5510_s9 + $0x90] sm:$0xff] }
 0x426   :  { %2095 = vmatpush1.msra.mxu0 %v2044_v15  ;;  %2204 = vmatpush1.msra.mxu1 %v2054_v44  ;;  %v2362_v15 = vld [vmem:[%s5510_s9 + $0x120] sm:$0xff]  ;;  %v2328_v44 = vld [vmem:[%s5510_s9 + $0x10] sm:$0xff] }
 0x427   :  { %2096 = vmatprep.subr.mxu0 %v2041_v58  ;;  %2205 = vmatprep.subr.mxu1 %v2051_v37  ;;  %v2377_v58 = vld [vmem:[%s5510_s9 + $0x198] sm:$0xff]  ;;  %v2343_v37 = vld [vmem:[%s5510_s9 + $0x88] sm:$0xff] }
 0x428   :  { %2097 = vmatpush1.msra.mxu0 %v2040_v59  ;;  %2206 = vmatpush1.msra.mxu1 %v2050_v47  ;;  %v2361_v59 = vld [vmem:[%s5510_s9 + $0x118] sm:$0xff]  ;;  %v2327_v47 = vld [vmem:[%s5510_s9 + $0x8] sm:$0xff] }
 0x429   :  { %2098 = vmatprep.subr.mxu0 %v2037_v60  ;;  %2207 = vmatprep.subr.mxu1 %v2047_v24  ;;  %v2376_v60 = vld [vmem:[%s5510_s9 + $0x190] sm:$0xff]  ;;  %v2342_v24 = vld [vmem:[%s5510_s9 + $0x80] sm:$0xff] }
 0x42a   :  { %2099 = vmatpush1.msra.mxu0 %v2036_v63  ;;  %2208 = vmatpush1.msra.mxu1 %v2046_v1  ;;  %v2360_v63 = vld [vmem:[%s5510_s9 + $0x110] sm:$0xff]  ;;  %v2326_v1 = vld [vmem:[%s5510_s9] sm:$0xff] }
 0x42b   :  { %3156 = vmatmul.mubr.msk.f32.vlgmr.msra.gmra.mxu0 %vm1510_vm1, %v4925_v19  ;;  %2209 = vmatprep.subr.mxu1 %v2043_v20  ;;  %v2375_v20 = vld [vmem:[%s5510_s9 + $0x188] sm:$0xff] }
 0x42c   :  { %2210 = vmatpush1.msra.mxu1 %v2042_v2  ;;  %2138 = vmatprep.mubr.f32.mxu0 %v5539_v40  ;;  %v2359_v2 = vld [vmem:[%s5510_s9 + $0x108] sm:$0xff] }
 0x42d   :  { %2211 = vmatprep.subr.mxu1 %v2039_v29  ;;  %2245 = vmatprep.mubr.f32.mxu1 %v5539_v40  ;;  %v2374_v29 = vld [vmem:[%s5510_s9 + $0x180] sm:$0xff] }
 0x42e   :  { %2212 = vmatpush1.msra.mxu1 %v2038_v5  ;;  %3436 = vmatprep.subr.mxu0 %v2357_v48  ;;  %v2358_v5 = vld [vmem:[%s5510_s9 + $0x100] sm:$0xff]  ;;  %v5330_v48 = vld [vmem:[%s5503_s2 + $0x78] sm:$0xff] }
 0x42f   :  { %3157 = vmatmul.mubr.msk.f32.gmra.mxu0 %vm1510_vm1, %v4927_v31  ;;  %3164 = vmatmul.mubr.msk.f32.vlgmr.msra.gmra.mxu1 %vm1510_vm1, %v4925_v19  ;;  %v2373_v19 = vld [vmem:[%s5510_s9 + $0x178] sm:$0xff] }
 0x430   :  { %2144 = vmatprep.mubr.f32.mxu0 %v5539_v40  ;;  %2251 = vmatprep.mubr.f32.mxu1 %v5539_v40 }
 0x431   :  { %3437 = vmatpush3.msra.mxu0 %v2341_v7  ;;  %3492 = vmatprep.subr.mxu1 %v2389_v32 }
 0x432   :  { %3438 = vmatprep.subr.mxu0 %v2356_v28  ;;  %3493 = vmatpush3.msra.mxu1 %v2373_v19 }
 0x433   :  { %3158 = vmatmul.mubr.msk.f32.gmra.mxu0 %vm1510_vm1, %v4934_v52  ;;  %3165 = vmatmul.mubr.msk.f32.gmra.mxu1 %vm1510_vm1, %v4927_v31  ;;  %v2355_v31 = vld [vmem:[%s5510_s9 + $0xe8] sm:$0xff] }
 0x434   :  { %2150 = vmatprep.mubr.f32.mxu0 %v5539_v40  ;;  %2257 = vmatprep.mubr.f32.mxu1 %v5539_v40 }
 0x435   :  { %3439 = vmatpush3.msra.mxu0 %v2340_v49  ;;  %3494 = vmatprep.subr.mxu1 %v2388_v46 }
 0x436   :  { %3440 = vmatprep.subr.mxu0 %v2355_v31 }
 0x437   :  { %3159 = vmatmul.mubr.msk.f32.gmra.mxu0 %vm1510_vm1, %v4936_v17  ;;  %3166 = vmatmul.mubr.msk.f32.gmra.mxu1 %vm1510_vm1, %v4934_v52  ;;  %v2354_v52 = vld [vmem:[%s5510_s9 + $0xe0] sm:$0xff] }
 0x438   :  { %2156 = vmatprep.mubr.f32.mxu0 %v5539_v40  ;;  %2263 = vmatprep.mubr.f32.mxu1 %v5539_v40 }
 0x439   :  { %3441 = vmatpush3.msra.mxu0 %v2339_v33 }
 0x43a   :  { %3442 = vmatprep.subr.mxu0 %v2354_v52 }
 0x43b   :  { %3160 = vmatmul.mubr.msk.f32.gmra.mxu0 %vm1510_vm1, %v4978_v4  ;;  %3167 = vmatmul.mubr.msk.f32.gmra.mxu1 %vm1510_vm1, %v4936_v17  ;;  %v2372_v17 = vld [vmem:[%s5510_s9 + $0x170] sm:$0xff] }
 0x43c   :  { %2162 = vmatprep.mubr.f32.mxu0 %v5539_v40  ;;  %2269 = vmatprep.mubr.f32.mxu1 %v5539_v40 }
 0x43d   :  { %3495 = vmatpush3.msra.mxu1 %v2372_v17  ;;  %3443 = vmatpush3.msra.mxu0 %v2338_v8  ;;  %v5352_v8 = vld [vmem:[%s5505_s4] sm:$0xff] }
 0x43e   :  { %3496 = vmatprep.subr.mxu1 %v2387_v9  ;;  %3444 = vmatprep.subr.mxu0 %v2353_v10 }
 0x43f   :  { %3161 = vmatmul.mubr.msk.f32.gmra.mxu0 %vm1510_vm1, %v4981_v51  ;;  %3168 = vmatmul.mubr.msk.f32.gmra.mxu1 %vm1510_vm1, %v4978_v4  ;;  %v2334_v4 = vld [vmem:[%s5510_s9 + $0x40] sm:$0xff] }
 0x440   :  { %2168 = vmatprep.mubr.f32.mxu0 %v5539_v40  ;;  %2275 = vmatprep.mubr.f32.mxu1 %v5539_v40 }
 0x441   :  { %3497 = vmatpush3.msra.mxu1 %v2371_v61  ;;  %3445 = vmatpush3.msra.mxu0 %v2337_v13 }
 0x442   :  { %3498 = vmatprep.subr.mxu1 %v2386_v22  ;;  %3446 = vmatprep.subr.mxu0 %v2352_v6 }
 0x443   :  { %3162 = vmatmul.mubr.msk.f32.gmra.mxu0 %vm1510_vm1, %v4997_v45  ;;  %3169 = vmatmul.mubr.msk.f32.gmra.mxu1 %vm1510_vm1, %v4981_v51  ;;  %v2383_v51 = vld [vmem:[%s5510_s9 + $0x1c8] sm:$0xff] }
 0x444   :  { %2174 = vmatprep.mubr.f32.mxu0 %v5539_v40  ;;  %2281 = vmatprep.mubr.f32.mxu1 %v5539_v40 }
 0x445   :  { %3499 = vmatpush3.msra.mxu1 %v2370_v27  ;;  %3447 = vmatpush3.msra.mxu0 %v2336_v23  ;;  %v5359_v27 = vld [vmem:[%s5505_s4 + $0x8] sm:$0xff] }
 0x446   :  { %3500 = vmatprep.subr.mxu1 %v2385_v21  ;;  %3448 = vmatprep.subr.mxu0 %v2351_v16 }
 0x447   :  { %3163 = vmatmul.mubr.msk.f32.gmra.mxu0 %vm1510_vm1, %v5004_v26  ;;  %3170 = vmatmul.mubr.msk.f32.gmra.mxu1 %vm1510_vm1, %v4997_v45  ;;  %v2366_v45 = vld [vmem:[%s5510_s9 + $0x140] sm:$0xff] }
 0x448   :  { %2287 = vmatprep.mubr.f32.mxu1 %v5539_v40  ;;  %3501 = vmatpush3.msra.mxu1 %v2369_v53  ;;  %v2381_v40 = vld [vmem:[%s5510_s9 + $0x1b8] sm:$0xff] }
 0x449   :  { %3449 = vmatpush3.msra.mxu0 %v2335_v50  ;;  %3502 = vmatprep.subr.mxu1 %v2384_v57 }
 0x44a   :  { %3450 = vmatprep.subr.mxu0 %v2350_v3  ;;  %3503 = vmatpush3.msra.mxu1 %v2368_v36 }
 0x44b   :  { %3171 = vmatmul.mubr.msk.f32.gmra.mxu1 %vm1510_vm1, %v5004_v26  ;;  %3451 = vmatpush3.msra.mxu0 %v2334_v4  ;;  %v2347_v26 = vld [vmem:[%s5510_s9 + $0xa8] sm:$0xff] }
 0x44c   :  { %3504 = vmatprep.subr.mxu1 %v2383_v51  ;;  %3452 = vmatprep.subr.mxu0 %v2349_v62 }
 0x44d   :  { %3505 = vmatpush3.msra.mxu1 %v2367_v11  ;;  %3453 = vmatpush3.msra.mxu0 %v2333_v18 }
 0x44e   :  { %3506 = vmatprep.subr.mxu1 %v2382_v34  ;;  %3454 = vmatprep.subr.mxu0 %v2348_v43 }
 0x44f   :  { %3507 = vmatpush3.msra.mxu1 %v2366_v45  ;;  %3455 = vmatpush3.msra.mxu0 %v2332_v41 }
 0x450   :  { %3508 = vmatprep.subr.mxu1 %v2381_v40  ;;  %3456 = vmatprep.subr.mxu0 %v2347_v26 }
 0x451   :  { %3509 = vmatpush3.msra.mxu1 %v2365_v42  ;;  %3457 = vmatpush3.msra.mxu0 %v2331_v30 }
 0x452   :  { %3510 = vmatprep.subr.mxu1 %v2380_v38  ;;  %3458 = vmatprep.subr.mxu0 %v2346_v55 }
 0x453   :  { %3511 = vmatpush3.msra.mxu1 %v2364_v0  ;;  %3459 = vmatpush3.msra.mxu0 %v2330_v25 }
 0x454   :  { %3512 = vmatprep.subr.mxu1 %v2379_v39  ;;  %3460 = vmatprep.subr.mxu0 %v2345_v56 }
 0x455   :  { %3513 = vmatpush3.msra.mxu1 %v2363_v35  ;;  %3461 = vmatpush3.msra.mxu0 %v2329_v12 }
 0x456   :  { %3514 = vmatprep.subr.mxu1 %v2378_v14  ;;  %3462 = vmatprep.subr.mxu0 %v2344_v54 }
 0x457   :  { %3515 = vmatpush3.msra.mxu1 %v2362_v15  ;;  %3463 = vmatpush3.msra.mxu0 %v2328_v44 }
 0x458   :  { %3516 = vmatprep.subr.mxu1 %v2377_v58  ;;  %3464 = vmatprep.subr.mxu0 %v2343_v37 }
 0x459   :  { %3517 = vmatpush3.msra.mxu1 %v2361_v59  ;;  %3465 = vmatpush3.msra.mxu0 %v2327_v47 }
 0x45a   :  { %3518 = vmatprep.subr.mxu1 %v2376_v60  ;;  %3466 = vmatprep.subr.mxu0 %v2342_v24 }
 0x45b   :  { %3519 = vmatpush3.msra.mxu1 %v2360_v63  ;;  %3467 = vmatpush3.msra.mxu0 %v2326_v1 }
 0x45c   :  { %3520 = vmatprep.subr.mxu1 %v2375_v20  ;;  %3816 = vmatprep.subr.mxu0 %v5330_v48 }
 0x45d   :  { %3521 = vmatpush3.msra.mxu1 %v2359_v2 }
 0x45e   :  { %3522 = vmatprep.subr.mxu1 %v2374_v29 }
 0x45f   :  { %3523 = vmatpush3.msra.mxu1 %v2358_v5 }
 0x4be   :  { %v5333_v7 = vpop.f32.mrf.mxu0 }
 0x4c0   :  { %v5335_v28 = vpop.f32.mrf.mxu0 }
 0x4c2   :  { %v5337_v32 = vpop.f32.mrf.mxu1 }
 0x4c4   :  { %v5341_v19 = vpop.f32.mrf.mxu1 }
 0x4db   :  { %v5339_v49 = vpop.f32.mrf.mxu0 }
 0x4dd   :  { %v5343_v31 = vpop.f32.mrf.mxu0 }
 0x4df   :  { %v5345_v33 = vpop.f32.mrf.mxu1 }
 0x4e1   :  { %v5347_v52 = vpop.f32.mrf.mxu1 }
 0x4eb   :  { %v2134_v46 = vpop.f32.mrf.mxu0 }
 0x4ec   :  { %v2294_v10 = vmul.f32 %v5352_v8, %v2134_v46 }
 0x4ed   :  { %v2136_v17 = vpop.f32.mrf.mxu0 }
 0x4ee   :  { %v2295_v9 = vmul.f32 %v5352_v8, %v2136_v17 }
 0x4ef   :  { %v2140_v61 = vpop.f32.mrf.mxu0  ;;  %v2247_v13 = vpop.f32.mrf.mxu1 }
 0x4f0   :  { %2454 = vmatprep.mubr.f32.mxu0 %v2295_v9  ;;  %v2298_v16 = vmul.f32 %v5359_v27, %v2140_v61  ;;  %v2296_v53 = vmul.f32 %v5352_v8, %v2247_v13 }
 0x4f1   :  { %v2142_v22 = vpop.f32.mrf.mxu0  ;;  %v2249_v6 = vpop.f32.mrf.mxu1  ;;  %2455 = vmatmul.mubr.f32.vlgmr.msra.gmra.mxu0 %v2294_v10 }
 0x4f2   :  { %v2299_v23 = vmul.f32 %v5359_v27, %v2142_v22  ;;  %v2297_v21 = vmul.f32 %v5352_v8, %v2249_v6  ;;  %3817 = vmatpush3.msra.mxu0 %v5330_v48 }
 0x4f3   :  { %v2146_v50 = vpop.f32.mrf.mxu0  ;;  %v2253_v57 = vpop.f32.mrf.mxu1 }
 0x4f4   :  { %2459 = vmatprep.mubr.f32.mxu0 %v2299_v23  ;;  %2559 = vmatprep.mubr.f32.mxu1 %v2297_v21  ;;  %v2302_v62 = vmul.f32 %v5352_v8, %v2146_v50  ;;  %v2300_v11 = vmul.f32 %v5359_v27, %v2253_v57  ;;  %v2757_v50 = vld [vmem:[%s5503_s2 + $0x98] sm:$0xff] }
 0x4f5   :  { %v2148_v3 = vpop.f32.mrf.mxu0  ;;  %v2255_v36 = vpop.f32.mrf.mxu1  ;;  %2460 = vmatmul.mubr.f32.gmra.mxu0 %v2298_v16  ;;  %2560 = vmatmul.mubr.f32.vlgmr.msra.gmra.mxu1 %v2296_v53  ;;  %v5395_v53 = vld [vmem:[%s5503_s2 + $0x70] sm:$0xff] }
 0x4f6   :  { %v2303_v4 = vmul.f32 %v5352_v8, %v2148_v3  ;;  %v2301_v51 = vmul.f32 %v5359_v27, %v2255_v36  ;;  %3818 = vmatprep.subr.mxu0 %v5395_v53  ;;  %3836 = vmatprep.subr.mxu1 %v2757_v50 }
 0x4f7   :  { %v2152_v18 = vpop.f32.mrf.mxu0  ;;  %v2259_v34 = vpop.f32.mrf.mxu1  ;;  %3819 = vmatpush3.msra.mxu0 %v5395_v53  ;;  %3837 = vmatpush3.msra.mxu1 %v2757_v50 }
 0x4f8   :  { %2464 = vmatprep.mubr.f32.mxu0 %v2303_v4  ;;  %2564 = vmatprep.mubr.f32.mxu1 %v2301_v51  ;;  %v2306_v26 = vmul.f32 %v5359_v27, %v2152_v18  ;;  %v2304_v42 = vmul.f32 %v5352_v8, %v2259_v34 }
 0x4f9   :  { %v2154_v43 = vpop.f32.mrf.mxu0  ;;  %v2261_v45 = vpop.f32.mrf.mxu1  ;;  %2465 = vmatmul.mubr.f32.gmra.mxu0 %v2302_v62  ;;  %2565 = vmatmul.mubr.f32.gmra.mxu1 %v2300_v11 }
 0x4fa   :  { %v2307_v41 = vmul.f32 %v5359_v27, %v2154_v43  ;;  %v2305_v40 = vmul.f32 %v5352_v8, %v2261_v45 }
 0x4fb   :  { %v2158_v30 = vpop.f32.mrf.mxu0  ;;  %v2265_v38 = vpop.f32.mrf.mxu1 }
 0x4fc   :  { %2469 = vmatprep.mubr.f32.mxu0 %v2307_v41  ;;  %2569 = vmatprep.mubr.f32.mxu1 %v2305_v40  ;;  %v2310_v56 = vmul.f32 %v5352_v8, %v2158_v30  ;;  %v2308_v35 = vmul.f32 %v5359_v27, %v2265_v38 }
 0x4fd   :  { %v2160_v55 = vpop.f32.mrf.mxu0  ;;  %v2267_v0 = vpop.f32.mrf.mxu1  ;;  %2470 = vmatmul.mubr.f32.gmra.mxu0 %v2306_v26  ;;  %2570 = vmatmul.mubr.f32.gmra.mxu1 %v2304_v42 }
 0x4fe   :  { %v2311_v25 = vmul.f32 %v5352_v8, %v2160_v55  ;;  %v2309_v39 = vmul.f32 %v5359_v27, %v2267_v0 }
 0x4ff   :  { %v2164_v12 = vpop.f32.mrf.mxu0  ;;  %v2271_v14 = vpop.f32.mrf.mxu1 }
 0x500   :  { %2474 = vmatprep.mubr.f32.mxu0 %v2311_v25  ;;  %2574 = vmatprep.mubr.f32.mxu1 %v2309_v39  ;;  %v2314_v37 = vmul.f32 %v5359_v27, %v2164_v12  ;;  %v2312_v59 = vmul.f32 %v5352_v8, %v2271_v14 }
 0x501   :  { %v2166_v54 = vpop.f32.mrf.mxu0  ;;  %v2273_v15 = vpop.f32.mrf.mxu1  ;;  %2475 = vmatmul.mubr.f32.gmra.mxu0 %v2310_v56  ;;  %2575 = vmatmul.mubr.f32.gmra.mxu1 %v2308_v35 }
 0x502   :  { %v2315_v44 = vmul.f32 %v5359_v27, %v2166_v54  ;;  %v2313_v58 = vmul.f32 %v5352_v8, %v2273_v15 }
 0x503   :  { %v2170_v47 = vpop.f32.mrf.mxu0  ;;  %v2277_v60 = vpop.f32.mrf.mxu1 }
 0x504   :  { %2479 = vmatprep.mubr.f32.mxu0 %v2315_v44  ;;  %2579 = vmatprep.mubr.f32.mxu1 %v2313_v58  ;;  %v2318_v2 = vmul.f32 %v5352_v8, %v2170_v47  ;;  %v2316_v29 = vmul.f32 %v5359_v27, %v2277_v60 }
 0x505   :  { %v2172_v24 = vpop.f32.mrf.mxu0  ;;  %v2279_v63 = vpop.f32.mrf.mxu1  ;;  %2480 = vmatmul.mubr.f32.gmra.mxu0 %v2314_v37  ;;  %2580 = vmatmul.mubr.f32.gmra.mxu1 %v2312_v59 }
 0x506   :  { %v2319_v1 = vmul.f32 %v5352_v8, %v2172_v24  ;;  %v2317_v20 = vmul.f32 %v5359_v27, %v2279_v63 }
 0x507   :  { %v2176_v5 = vpop.f32.mrf.mxu0  ;;  %v2283_v46 = vpop.f32.mrf.mxu1 }
 0x508   :  { %2484 = vmatprep.mubr.f32.mxu0 %v2319_v1  ;;  %2584 = vmatprep.mubr.f32.mxu1 %v2317_v20  ;;  %v2322_v13 = vmul.f32 %v5359_v27, %v2176_v5  ;;  %v2320_v22 = vmul.f32 %v5352_v8, %v2283_v46 }
 0x509   :  { %v2178_v17 = vpop.f32.mrf.mxu0  ;;  %v2285_v9 = vpop.f32.mrf.mxu1  ;;  %2485 = vmatmul.mubr.f32.gmra.mxu0 %v2318_v2  ;;  %2585 = vmatmul.mubr.f32.gmra.mxu1 %v2316_v29 }
 0x50a   :  { %v2323_v10 = vmul.f32 %v5359_v27, %v2178_v17  ;;  %v2321_v61 = vmul.f32 %v5352_v8, %v2285_v9  ;;  %v5402_v8 = vld [vmem:[%s5503_s2 + $0x68] sm:$0xff] }
 0x50b   :  { %v2289_v6 = vpop.f32.mrf.mxu1  ;;  %3820 = vmatprep.subr.mxu0 %v5402_v8 }
 0x50c   :  { %2489 = vmatprep.mubr.f32.mxu0 %v2323_v10  ;;  %2589 = vmatprep.mubr.f32.mxu1 %v2321_v61  ;;  %v2324_v16 = vmul.f32 %v5359_v27, %v2289_v6 }
 0x50d   :  { %v2291_v23 = vpop.f32.mrf.mxu1  ;;  %2490 = vmatmul.mubr.f32.gmra.mxu0 %v2322_v13  ;;  %2590 = vmatmul.mubr.f32.gmra.mxu1 %v2320_v22 }
 0x50e   :  { %v2325_v21 = vmul.f32 %v5359_v27, %v2291_v23  ;;  %3821 = vmatpush3.msra.mxu0 %v5402_v8  ;;  %v5409_v27 = vld [vmem:[%s5503_s2 + $0x60] sm:$0xff] }
 0x50f   :  { %3822 = vmatprep.subr.mxu0 %v5409_v27 }
 0x510   :  { %2594 = vmatprep.mubr.f32.mxu1 %v2325_v21  ;;  %3823 = vmatpush3.msra.mxu0 %v5409_v27 }
 0x511   :  { %2595 = vmatmul.mubr.f32.gmra.mxu1 %v2324_v16 }
 0x5b1   :  { %v3468_v57 = vpop.f32.mrf.mxu0 }
 0x5b3   :  { %v3469_v3 = vpop.f32.mrf.mxu0 }
 0x5b4   :  { %v3470_v11 = vadd.f32 %v3469_v3, %v3468_v57 }
 0x5b5   :  { %v3471_v36 = vpop.f32.mrf.mxu0  ;;  %v3524_v4 = vpop.f32.mrf.mxu1 }
 0x5b7   :  { %v3472_v51 = vpop.f32.mrf.mxu0  ;;  %v3525_v62 = vpop.f32.mrf.mxu1 }
 0x5b8   :  { %v3526_v18 = vadd.f32 %v3525_v62, %v3524_v4  ;;  %v3473_v26 = vadd.f32 %v3472_v51, %v3471_v36 }
 0x5b9   :  { %v3474_v34 = vpop.f32.mrf.mxu0  ;;  %v3527_v43 = vpop.f32.mrf.mxu1 }
 0x5ba   :  { %v2562_v45 = vadd.f32 %v3526_v18, %v3470_v11  ;;  %v2755_v18 = vld [vmem:[%s5503_s2 + $0x88] sm:$0xff] }
 0x5bb   :  { %v3475_v41 = vpop.f32.mrf.mxu0  ;;  %v3528_v40 = vpop.f32.mrf.mxu1 }
 0x5bc   :  { %v2600_v42 = vadd.f32 %v2562_v45, %v5335_v28  ;;  %v3529_v30 = vadd.f32 %v3528_v40, %v3527_v43  ;;  %v3476_v56 = vadd.f32 %v3475_v41, %v3474_v34 }
 0x5bd   :  { %v3477_v38 = vpop.f32.mrf.mxu0  ;;  %v3530_v55 = vpop.f32.mrf.mxu1 }
 0x5be   :  { %v2567_v0 = vadd.f32 %v3529_v30, %v3473_v26  ;;  %3824 = vmatprep.mubr.msk.f32.mxu0 %vm78_vm0, %v2600_v42 }
 0x5bf   :  { %v3478_v25 = vpop.f32.mrf.mxu0  ;;  %v3531_v39 = vpop.f32.mrf.mxu1 }
 0x5c0   :  { %v2601_v35 = vadd.f32 %v5333_v7, %v2567_v0  ;;  %v3532_v12 = vadd.f32 %v3531_v39, %v3530_v55  ;;  %v3479_v28 = vadd.f32 %v3478_v25, %v3477_v38 }
 0x5c1   :  { %v3480_v14 = vpop.f32.mrf.mxu0  ;;  %v3533_v54 = vpop.f32.mrf.mxu1 }
 0x5c2   :  { %v2572_v15 = vadd.f32 %v3532_v12, %v3476_v56  ;;  %3825 = vmatmul.mubr.msk.f32.vlgmr.msra.gmra.mxu0 %vm78_vm0, %v2601_v35 }
 0x5c3   :  { %v3481_v44 = vpop.f32.mrf.mxu0  ;;  %v3534_v58 = vpop.f32.mrf.mxu1 }
 0x5c4   :  { %v2602_v37 = vadd.f32 %v2572_v15, %v5341_v19  ;;  %v3535_v59 = vadd.f32 %v3534_v58, %v3533_v54  ;;  %v3482_v7 = vadd.f32 %v3481_v44, %v3480_v14 }
 0x5c5   :  { %v3483_v47 = vpop.f32.mrf.mxu0  ;;  %v3536_v60 = vpop.f32.mrf.mxu1 }
 0x5c6   :  { %v2577_v24 = vadd.f32 %v3535_v59, %v3479_v28  ;;  %3827 = vmatprep.mubr.msk.f32.mxu0 %vm78_vm0, %v2602_v37 }
 0x5c7   :  { %v3484_v63 = vpop.f32.mrf.mxu0  ;;  %v3537_v1 = vpop.f32.mrf.mxu1 }
 0x5c8   :  { %v2603_v20 = vadd.f32 %v5337_v32, %v2577_v24  ;;  %v3538_v2 = vadd.f32 %v3537_v1, %v3536_v60  ;;  %v3485_v19 = vadd.f32 %v3484_v63, %v3483_v47 }
 0x5c9   :  { %v3486_v29 = vpop.f32.mrf.mxu0  ;;  %v3539_v5 = vpop.f32.mrf.mxu1 }
 0x5ca   :  { %v2582_v46 = vadd.f32 %v3538_v2, %v3482_v7  ;;  %3828 = vmatmul.mubr.msk.f32.gmra.mxu0 %vm78_vm0, %v2603_v20 }
 0x5cb   :  { %v3487_v17 = vpop.f32.mrf.mxu0  ;;  %v3540_v9 = vpop.f32.mrf.mxu1 }
 0x5cc   :  { %v2604_v10 = vadd.f32 %v2582_v46, %v5343_v31  ;;  %v3541_v61 = vadd.f32 %v3540_v9, %v3539_v5  ;;  %v3488_v21 = vadd.f32 %v3487_v17, %v3486_v29 }
 0x5cd   :  { %v3489_v13 = vpop.f32.mrf.mxu0  ;;  %v3542_v22 = vpop.f32.mrf.mxu1 }
 0x5ce   :  { %v2587_v6 = vadd.f32 %v3541_v61, %v3485_v19  ;;  %3830 = vmatprep.mubr.msk.f32.mxu0 %vm78_vm0, %v2604_v10 }
 0x5cf   :  { %v3543_v23 = vpop.f32.mrf.mxu1  ;;  %v3490_v50 = vpop.f32.mrf.mxu0 }
 0x5d0   :  { %v2605_v32 = vadd.f32 %v5339_v49, %v2587_v6  ;;  %v3544_v16 = vadd.f32 %v3543_v23, %v3542_v22  ;;  %v3491_v4 = vadd.f32 %v3490_v50, %v3489_v13  ;;  %v2756_v49 = vld [vmem:[%s5503_s2 + $0x90] sm:$0xff] }
 0x5d1   :  { %v3545_v57 = vpop.f32.mrf.mxu1  ;;  %3838 = vmatprep.subr.mxu1 %v2756_v49 }
 0x5d2   :  { %v2592_v3 = vadd.f32 %v3544_v16, %v3488_v21  ;;  %3831 = vmatmul.mubr.msk.f32.gmra.mxu0 %vm78_vm0, %v2605_v32  ;;  %3839 = vmatpush3.msra.mxu1 %v2756_v49 }
 0x5d3   :  { %v3546_v36 = vpop.f32.mrf.mxu1  ;;  %3840 = vmatprep.subr.mxu1 %v2755_v18 }
 0x5d4   :  { %v2606_v31 = vadd.f32 %v2592_v3, %v5347_v52  ;;  %v3547_v51 = vadd.f32 %v3546_v36, %v3545_v57  ;;  %3841 = vmatpush3.msra.mxu1 %v2755_v18  ;;  %v2754_v52 = vld [vmem:[%s5503_s2 + $0x80] sm:$0xff] }
 0x5d5   :  { %3842 = vmatprep.subr.mxu1 %v2754_v52 }
 0x5d6   :  { %v2597_v62 = vadd.f32 %v3547_v51, %v3491_v4  ;;  %3833 = vmatprep.mubr.msk.f32.mxu0 %vm78_vm0, %v2606_v31  ;;  %3843 = vmatpush3.msra.mxu1 %v2754_v52 }
 0x5d7   :  { %3850 = vmatprep.subr.mxu1 %v5330_v48 }
 0x5d8   :  { %v2607_v11 = vadd.f32 %v5345_v33, %v2597_v62  ;;  %v5445_v33 = vld [vmem:[%s5504_s3 + $0x3] ss:$0 sm:$0xff] }
 0x5da   :  { %3834 = vmatmul.mubr.msk.f32.gmra.mxu0 %vm78_vm0, %v2607_v11 }
 0x682   :  { %v3826_v34 = vpop.f32.mrf.mxu0 }
 0x683   :  { %v2713_v43 = vadd.f32 %v3826_v34, %v5445_v33 }
 0x684   :  { %v2707_v45 = vpop.f32.mrf.mxu0 }
 0x685   :  { %v2708_v41 = vadd.f32 %v5445_v33, %v2707_v45 }
 0x687   :  { %3901 = vtanh.f32 %v2708_v41 }
 0x688   :  { %3903 = vtanh.f32 %v2713_v43 }
 0x68a   :  { %v3829_v40 = vpop.f32.mrf.mxu0 }
 0x68c   :  { %v2717_v26 = vpop.f32.mrf.mxu0 }
 0x68d   :  { %v2718_v35 = vadd.f32 %v5445_v33, %v2717_v26 }
 0x692   :  { %v3832_v42 = vpop.f32.mrf.mxu0 }
 0x693   :  { %v2733_v38 = vadd.f32 %v3832_v42, %v5445_v33 }
 0x694   :  { %v3902_v30 = vpop.eup %3901  ;;  %v2727_v55 = vpop.f32.mrf.mxu0 }
 0x695   :  { %v3904_v0 = vpop.eup %3903  ;;  %v2728_v25 = vadd.f32 %v5445_v33, %v2727_v55  ;;  %3844 = vmatprep.mubr.msk.f32.mxu1 %vm78_vm0, %v3902_v30 }
 0x696   :  { %3845 = vmatmul.mubr.msk.f32.vlgmr.msra.gmra.mxu1 %vm78_vm0, %v3904_v0 }
 0x697   :  { %3905 = vtanh.f32 %v2728_v25  ;;  %3851 = vmatpush3.msra.mxu1 %v5330_v48  ;;  %v2723_v48 = vadd.f32 %v3829_v40, %v5445_v33  ;;  %v3186_v25 = vld [vmem:[%s5504_s3 + $0x5] ss:$0 sm:$0xff] }
 0x698   :  { %3907 = vtanh.f32 %v2733_v38  ;;  %3852 = vmatprep.subr.mxu1 %v5395_v53 }
 0x699   :  { %3853 = vmatpush3.msra.mxu1 %v5395_v53  ;;  %3909 = vtanh.f32 %v2723_v48 }
 0x69a   :  { %3854 = vmatprep.subr.mxu1 %v5402_v8  ;;  %3911 = vtanh.f32 %v2718_v35  ;;  %v3835_v53 = vpop.f32.mrf.mxu0 }
 0x69b   :  { %3855 = vmatpush3.msra.mxu1 %v5402_v8  ;;  %v3181_v8 = vld [vmem:[%s5504_s3 + $0x4] ss:$0 sm:$0xff] }
 0x69c   :  { %3856 = vmatprep.subr.mxu1 %v5409_v27  ;;  %v2737_v12 = vpop.f32.mrf.mxu0 }
 0x69d   :  { %3857 = vmatpush3.msra.mxu1 %v5409_v27  ;;  %v2743_v27 = vadd.f32 %v3835_v53, %v5445_v33  ;;  %v2738_v58 = vadd.f32 %v5445_v33, %v2737_v12 }
 0x69f   :  { %3913 = vtanh.f32 %v2743_v27 }
 0x6a0   :  { %3915 = vtanh.f32 %v2738_v58 }
 0x6a4   :  { %v3906_v39 = vpop.eup %3905 }
 0x6a5   :  { %v3908_v56 = vpop.eup %3907  ;;  %3847 = vmatprep.mubr.msk.f32.mxu1 %vm78_vm0, %v3906_v39 }
 0x6a6   :  { %3848 = vmatmul.mubr.msk.f32.gmra.mxu1 %vm78_vm0, %v3908_v56  ;;  %v3910_v15 = vpop.eup %3909 }
 0x6a7   :  { %v3912_v59 = vpop.eup %3911 }
 0x6ac   :  { %v3914_v7 = vpop.eup %3913 }
 0x6ad   :  { %v3916_v5 = vpop.eup %3915 }
 0x756   :  { %v3846_v14 = vpop.f32.mrf.mxu1 }
 0x757   :  { %v2847_v54 = vadd.f32 %v3846_v14, %v3181_v8 }
 0x758   :  { %v2841_v44 = vpop.f32.mrf.mxu1 }
 0x759   :  { %v2842_v28 = vadd.f32 %v3181_v8, %v2841_v44  ;;  %v2861_v37 = vadd.f32 %v3910_v15, %v2847_v54 }
 0x75b   :  { %v2867_v47 = vsel %vm78_vm0, %v2861_v37, 0.0  ;;  %v2860_v60 = vadd.f32 %v3912_v59, %v2842_v28 }
 0x75c   :  { %2868 = vadd.xlane.f32.xlu1 %v2867_v47 }
 0x75d   :  { %v2864_v24 = vsel %vm78_vm0, %v2860_v60, 0.0 }
 0x75e   :  { %2865 = vadd.xlane.f32.xlu0 %v2864_v24 }
 0x766   :  { %v3849_v63 = vpop.f32.mrf.mxu1 }
 0x767   :  { %v2857_v1 = vadd.f32 %v3849_v63, %v3181_v8 }
 0x768   :  { %v2851_v20 = vpop.f32.mrf.mxu1 }
 0x769   :  { %v2852_v2 = vadd.f32 %v3181_v8, %v2851_v20  ;;  %v2863_v29 = vadd.f32 %v3914_v7, %v2857_v1  ;;  %v3187_v8 = vld [vmem:[%s5504_s3 + $0x6] ss:$0 sm:$0xff]  ;;  %s3983_s3 = smov [#allocation5]  }
 0x76a   :  { %s3045_s26 = sshll.u32 %s3983_s3, 4  ;;  %s3046_s26 = int_to_ptr.vmem [resolvable:$true] %s3045_s26 }
 0x76b   :  { %v2873_v46 = vsel %vm78_vm0, %v2863_v29, 0.0  ;;  %v2862_v17 = vadd.f32 %v3916_v5, %v2852_v2  ;;  %s3955_s9 = scalar_lea.vmem %s3046_s26, 512  ;;  %p3960_p6 = scmp.lt.s32.totalorder %s3046_s26, %s3046_s26 }
 0x76c   :  { %2874 = vadd.xlane.f32.xlu1 %v2873_v46  ;;  %p3956_p5 = scmp.ne.s32.totalorder %s3046_s26, %s3955_s9  ;;  %p3961_p7 = scmp.lt.s32.totalorder %s3955_s9, %s3955_s9 }
 0x76d   :  { %v2870_v9 = vsel %vm78_vm0, %v2862_v17, 0.0 }
 0x76e   :  { %2871 = vadd.xlane.f32.xlu0 %v2870_v9  ;;  %p3962_p8 = por %p3961_p7, %p3960_p6 }
 0x770   :  { %p3963_p9 = pnand %p3962_p8, %p3956_p5 }
 0x7e5   :  { %v2869_v19 = vpop.xlane.xlu1 %2868 }
 0x7e6   :  { %v2878_v10 = vmul.f32 0.03125, %v2869_v19 }
 0x7e7   :  { %v2866_v61 = vpop.xlane.xlu0 %2865 }
 0x7e8   :  { %v2882_v13 = vsub.f32 %v2861_v37, %v2878_v10  ;;  %v2877_v22 = vmul.f32 0.03125, %v2866_v61 }
 0x7ea   :  { %v2881_v6 = vsub.f32 %v2860_v60, %v2877_v22  ;;  %v2886_v23 = vmul.f32 %v2882_v13, %v2882_v13 }
 0x7ec   :  { %v2892_v21 = vsel %vm78_vm0, %v2886_v23, 0.0  ;;  %v2885_v32 = vmul.f32 %v2881_v6, %v2881_v6 }
 0x7ed   :  { %2893 = vadd.xlane.f32.xlu1 %v2892_v21 }
 0x7ee   :  { %v2889_v16 = vsel %vm78_vm0, %v2885_v32, 0.0 }
 0x7ef   :  { %2890 = vadd.xlane.f32.xlu0 %v2889_v16 }
 0x7f5   :  { %v2875_v50 = vpop.xlane.xlu1 %2874 }
 0x7f6   :  { %v2880_v57 = vmul.f32 0.03125, %v2875_v50 }
 0x7f7   :  { %v2872_v3 = vpop.xlane.xlu0 %2871 }
 0x7f8   :  { %v2884_v36 = vsub.f32 %v2863_v29, %v2880_v57  ;;  %v2879_v4 = vmul.f32 0.03125, %v2872_v3 }
 0x7fa   :  { %v2883_v31 = vsub.f32 %v2862_v17, %v2879_v4  ;;  %v2888_v51 = vmul.f32 %v2884_v36, %v2884_v36 }
 0x7fc   :  { %v2898_v62 = vsel %vm78_vm0, %v2888_v51, 0.0  ;;  %v2887_v11 = vmul.f32 %v2883_v31, %v2883_v31 }
 0x7fd   :  { %2899 = vadd.xlane.f32.xlu1 %v2898_v62 }
 0x7fe   :  { %v2895_v49 = vsel %vm78_vm0, %v2887_v11, 0.0 }
 0x7ff   :  { %2896 = vadd.xlane.f32.xlu0 %v2895_v49 }
 0x876   :  { %v2894_v18 = vpop.xlane.xlu1 %2893 }
 0x877   :  { %v2902_v52 = vmul.f32 0.03125, %v2894_v18 }
 0x878   :  { %v2891_v34 = vpop.xlane.xlu0 %2890 }
 0x879   :  { %v2906_v43 = vadd.f32 1e-12, %v2902_v52  ;;  %v2901_v45 = vmul.f32 0.03125, %v2891_v34 }
 0x87b   :  { %3917 = vrsqrt.f32 %v2906_v43  ;;  %v2905_v41 = vadd.f32 1e-12, %v2901_v45 }
 0x87d   :  { %3919 = vrsqrt.f32 %v2905_v41 }
 0x886   :  { %v2900_v40 = vpop.xlane.xlu1 %2899 }
 0x887   :  { %v2904_v26 = vmul.f32 0.03125, %v2900_v40 }
 0x888   :  { %v3918_v42 = vpop.eup %3917  ;;  %v2897_v30 = vpop.xlane.xlu0 %2896 }
 0x889   :  { %v2914_v38 = vmul.f32 %v3918_v42, %v2882_v13  ;;  %v2908_v55 = vadd.f32 1e-12, %v2904_v26  ;;  %v2903_v0 = vmul.f32 0.03125, %v2897_v30 }
 0x88a   :  { %v3920_v39 = vpop.eup %3919 }
 0x88b   :  { %3921 = vrsqrt.f32 %v2908_v55  ;;  %v2907_v56 = vadd.f32 1e-12, %v2903_v0  ;;  %v2913_v48 = vmul.f32 %v3920_v39, %v2881_v6  ;;  %v2923_v35 = vmul.f32 %v3186_v25, %v2914_v38 }
 0x88d   :  { %3923 = vrsqrt.f32 %v2907_v56  ;;  %v2922_v53 = vmul.f32 %v3186_v25, %v2913_v48  ;;  %v2932_v14 = vadd.f32 %v3187_v8, %v2923_v35 }
 0x88f   :  { %v2931_v12 = vadd.f32 %v3187_v8, %v2922_v53 }
 0x891   :  { %3858 = vmatprep.mubr.msk.f32.mxu1 %vm78_vm0, %v2931_v12 }
 0x892   :  { %3859 = vmatmul.mubr.msk.f32.vlgmr.msra.gmra.mxu1 %vm78_vm0, %v2932_v14 }
 0x898   :  { %v3922_v27 = vpop.eup %3921 }
 0x899   :  { %v2916_v54 = vmul.f32 %v3922_v27, %v2884_v36 }
 0x89a   :  { %v3924_v15 = vpop.eup %3923 }
 0x89b   :  { %v2915_v44 = vmul.f32 %v3924_v15, %v2883_v31  ;;  %v2925_v58 = vmul.f32 %v3186_v25, %v2916_v54 }
 0x89d   :  { %v2924_v28 = vmul.f32 %v3186_v25, %v2915_v44  ;;  %v2934_v59 = vadd.f32 %v3187_v8, %v2925_v58 }
 0x89f   :  { %v2933_v37 = vadd.f32 %v3187_v8, %v2924_v28 }
 0x8a1   :  { %3861 = vmatprep.mubr.msk.f32.mxu1 %vm78_vm0, %v2933_v37 }
 0x8a2   :  { %3862 = vmatmul.mubr.msk.f32.gmra.mxu1 %vm78_vm0, %v2934_v59 }
 0x952   :  { %v3860_v47 = vpop.f32.mrf.mxu1 }
 0x953   :  { %v3019_v60 = vadd.f32 %v3860_v47, %v5445_v33 }
 0x954   :  { %v3013_v24 = vpop.f32.mrf.mxu1 }
 0x955   :  { %3925 = vtanh.f32 %v3019_v60  ;;  %v3014_v63 = vadd.f32 %v5445_v33, %v3013_v24 }
 0x957   :  { %3927 = vtanh.f32 %v3014_v63 }
 0x962   :  { %v3926_v1 = vpop.eup %3925  ;;  %v3863_v7 = vpop.f32.mrf.mxu1 }
 0x963   :  { %3037 = vst.msk [vmem:[#allocation5 + $0x8] sm:$0xff] %vm78_vm0, %v3926_v1  ;;  %v3029_v20 = vadd.f32 %v3863_v7, %v5445_v33 }
 0x964   :  { %v3928_v2 = vpop.eup %3927  ;;  %v3023_v29 = vpop.f32.mrf.mxu1 }
 0x965   :  { %3036 = vst.msk [vmem:[#allocation5] sm:$0xff] %vm78_vm0, %v3928_v2  ;;  %3929 = vtanh.f32 %v3029_v20  ;;  %v3024_v5 = vadd.f32 %v5445_v33, %v3023_v29 }
 0x967   :  { %3931 = vtanh.f32 %v3024_v5 }
 0x972   :  { %v3930_v46 = vpop.eup %3929 }
 0x973   :  { %3039 = vst.msk [vmem:[#allocation5 + $0x18] sm:$0xff] %vm78_vm0, %v3930_v46 }
 0x974   :  { %v3932_v17 = vpop.eup %3931 }
 0x975   :  { %3038 = vst.msk [vmem:[#allocation5 + $0x10] sm:$0xff] %vm78_vm0, %v3932_v17 }
 0x976   :  { %3966 = shalt.err (!%p3963_p9)
}
 0x977   :  { %3051 = dma.vmem_to_hbm [thread:$0]  %s3046_s26, 512, %s5512_s11, [#allocation4], %s3980_s20, %s3980_s20, %s3981_s21  }
 0x978   :  { %3977 = dma.done.wait [#allocation4], 512  }
 0x979   :  { %3978 = vsyncadd [#allocation4], 4294966784 }
 0x97a   :  { %3055 = vsyncpa [#allocation3], 1 }
 0x97b   :  { %3056 = vsyncpa [#allocation4], 1 }

</bundles_post_ra>
